<compile_context>
chip_gen: v7x
topology: tpu7x:2x2x1
jax: 0.10.0
libtpu: 0.0.40
codegen_flags: <defaults>
</compile_context>

<pallas_src>
import functools

import jax
import jax.numpy as jnp
from jax import lax
from jax.experimental import pallas as pl
from jax.experimental.pallas import tpu as pltpu  # noqa: F401  (TPU backend)

N_BLOCKS = 5   # five ResBlocks in Generator.block
TAU = 0.75     # gumbel_softmax temperature


def generator_kernel(noise_ref, g_ref, wfc_ref, w_ref, b_ref, o_ref, *,
                     batch, seq_len, hidden, n_chars):
    B, L, H, C = batch, seq_len, hidden, n_chars

    # fc1: Linear(128, hidden*seq_len).  Weight columns are pre-permuted to
    # (l, c) order so the single lane-dense (N = L*H, multiple of 128) matmul
    # is directly position-major along its lane groups.
    fc = jnp.dot(noise_ref[...].astype(jnp.bfloat16), wfc_ref[...],
                 preferred_element_type=jnp.float32)
    fc = fc + b_ref[0:1, 0:L * H]                                      # (B, L*H)

    # (B, L*H) -> (L*B, H): lanes -> sublanes restack (row = l*B + b).
    h = jnp.concatenate([fc[:, l * H:(l + 1) * H] for l in range(L)], axis=0)

    zrows = jnp.zeros((B, H), jnp.float32)

    def conv3(t, wf, brow):
        # Conv1d(H, H, kernel_size=3, padding=1) as ONE matmul with the three
        # taps stacked along K: build [x(l-1) | x(l) | x(l+1)] and let the MXU
        # contraction sum the taps.  Row layout is position-major, so the +/-1
        # position shifts are +/-B row shifts; the zero rows are exactly the
        # conv's zero padding (rows from other batches never leak across).
        t_prev = jnp.concatenate([zrows, t[:-B]], axis=0)              # x[l-1]
        t_next = jnp.concatenate([t[B:], zrows], axis=0)               # x[l+1]
        t3 = jnp.concatenate([t_prev, t, t_next], axis=-1)             # (L*B, 3H)
        return jnp.dot(t3.astype(jnp.bfloat16), wf,
                       preferred_element_type=jnp.float32) + brow      # (L*B, H)

    for i in range(N_BLOCKS):            # static unroll over the 5 ResBlocks
        t = jnp.maximum(h, 0.0)          # ReLU
        y = conv3(t, w_ref[2 * i], b_ref[1 + 2 * i:2 + 2 * i, 0:H])
        t2 = jnp.maximum(y, 0.0)         # ReLU
        y2 = conv3(t2, w_ref[2 * i + 1], b_ref[2 + 2 * i:3 + 2 * i, 0:H])
        h = h + 0.3 * y2                 # residual: input + 0.3 * output

    # Position-major (L*B, H) -> batch-major (B*L, H) so the final store and
    # the wrapper's (B, L, C) view need no further transpose / HBM round trip.
    hb = jnp.concatenate([h[l * B + b:l * B + b + 1, :]
                          for b in range(B) for l in range(L)], axis=0)

    # conv1: Conv1d(hidden, n_chars, kernel_size=1) == matmul; its weight
    # lives zero-padded in the last slot of the conv-weight slab.
    wc = w_ref[2 * N_BLOCKS][0:H, 0:C]                                 # (H, C)
    bc = b_ref[1 + 2 * N_BLOCKS:2 + 2 * N_BLOCKS, 0:C]                 # (1, C)
    logits = jnp.dot(hb.astype(jnp.bfloat16), wc,
                     preferred_element_type=jnp.float32) + bc          # (B*L, C)

    # F.gumbel_softmax(tau=0.75, hard=False) with pre-sampled Gumbel noise.
    z = (logits + g_ref[...]) * (1.0 / TAU)
    z = z - jnp.max(z, axis=-1, keepdims=True)
    e = jnp.exp(z)
    denom = jnp.sum(e, axis=-1, keepdims=True)
    # approx EUP reciprocal: rows sum to 1 only to ~1e-3 (fine at 2e-2 tol).
    o_ref[...] = e * pl.reciprocal(denom, approx=True)


def pack_params(params):
    """One-time repack of PyTorch-shaped Generator params into kernel slabs.

    Returns (wfc, w_slab, b_slab):
      wfc    (128, L*H)             bf16  fc1 weight, columns permuted to l*H+c
      w_slab (2*N_BLOCKS+1, 3H, H)  bf16  10 fused conv3 weights + padded 1x1 conv
      b_slab (2*N_BLOCKS+2, L*H)    f32   [fc1 bias | 10 conv biases | 1x1 bias]
    """
    fc1_w, fc1_b, blocks, conv1_w, conv1_b = params
    C, H, _ = conv1_w.shape
    L = fc1_w.shape[0] // H
    assert C <= H, "packing assumes n_chars <= hidden"

    # fc1: PyTorch output feature f = c*L + l  ->  kernel column l*H + c.
    wfc = (fc1_w.reshape(H, L, -1).transpose(1, 0, 2)
           .reshape(L * H, -1).T.astype(jnp.bfloat16))                 # (128, L*H)

    def fuse_conv3(w):   # (H_out, H_in, 3) -> (3H_in, H_out): taps stacked on K
        return jnp.transpose(w, (2, 1, 0)).reshape(3 * H, H)

    conv_ws = [fuse_conv3(w) for blk in blocks for w in (blk[0], blk[2])]
    wc_pad = jnp.zeros((3 * H, H), jnp.float32).at[:H, :C].set(conv1_w[:, :, 0].T)
    w_slab = jnp.stack(conv_ws + [wc_pad]).astype(jnp.bfloat16)        # (11, 3H, H)

    Wb = L * H
    bfc_row = fc1_b.reshape(H, L).T.reshape(1, L * H)                  # (1, L*H)
    conv_bs = jnp.stack([b for blk in blocks for b in (blk[1], blk[3])])  # (10, H)
    conv_bs = jnp.pad(conv_bs, ((0, 0), (0, Wb - H)))
    bc_row = jnp.pad(conv1_b[None, :], ((0, 0), (0, Wb - C)))
    b_slab = jnp.concatenate([bfc_row, conv_bs, bc_row], axis=0)       # (12, L*H)
    return wfc, w_slab, b_slab.astype(jnp.float32)


@jax.jit
def generator_forward(packed, noise, gumbel):
    """noise: (B, 128) f32; gumbel: (B, L, C) pre-sampled Gumbel(0,1) noise."""
    wfc, w_slab, b_slab = packed
    B = noise.shape[0]
    H = w_slab.shape[2]
    L = wfc.shape[1] // H
    C = gumbel.shape[2]
    kernel = functools.partial(generator_kernel, batch=B, seq_len=L,
                               hidden=H, n_chars=C)
    out = pl.pallas_call(
        kernel,
        # No grid: single invocation, whole operands resident in VMEM (a few
        # hundred KB).  For large B, switch to a 1-D row-block grid with
        # dimension_semantics=("parallel",) to shard across v7x's two TCs.
        out_shape=jax.ShapeDtypeStruct((B * L, C), jnp.float32),
    )(noise, gumbel.reshape(B * L, C), wfc, w_slab, b_slab)
    return out.reshape(B, L, C)          # free: kernel output is batch-major


def generator_ref(noise, gumbel, params):
    """Pure-JAX reference mirroring the PyTorch Generator.forward."""
    fc1_w, fc1_b, blocks, conv1_w, conv1_b = params
    B = noise.shape[0]
    C, H, _ = conv1_w.shape
    L = fc1_w.shape[0] // H
    dn = ('NCH', 'OIH', 'NCH')

    out = noise @ fc1_w.T + fc1_b[None, :]                             # (B, H*L)
    out = out.reshape(B, H, L)                                         # NCW view
    for (wa_i, ba_i, wb_i, bb_i) in blocks:
        t = jax.nn.relu(out)
        y = lax.conv_general_dilated(t, wa_i, (1,), [(1, 1)],
                                     dimension_numbers=dn) + ba_i[None, :, None]
        t2 = jax.nn.relu(y)
        y2 = lax.conv_general_dilated(t2, wb_i, (1,), [(1, 1)],
                                      dimension_numbers=dn) + bb_i[None, :, None]
        out = out + 0.3 * y2
    out = lax.conv_general_dilated(out, conv1_w, (1,), 'VALID',
                                   dimension_numbers=dn) + conv1_b[None, :, None]
    out = jnp.transpose(out, (0, 2, 1)).reshape(B * L, C)              # (B*L, C)
    z = (out + gumbel.reshape(B * L, C)) / TAU
    return jax.nn.softmax(z, axis=-1).reshape(B, L, C)


def init_params(key, hidden, seq_len, n_chars):
    keys = iter(jax.random.split(key, 4 + 4 * N_BLOCKS))

    def rnd(shape, scale=0.1):
        return scale * jax.random.normal(next(keys), shape, jnp.float32)

    fc1_w = rnd((hidden * seq_len, 128))       # Linear(128, hidden*seq_len)
    fc1_b = rnd((hidden * seq_len,))
    blocks = []
    for _ in range(N_BLOCKS):
        blocks.append((rnd((hidden, hidden, 3)), rnd((hidden,)),       # conv_a
                       rnd((hidden, hidden, 3)), rnd((hidden,))))      # conv_b
    conv1_w = rnd((n_chars, hidden, 1))        # Conv1d(hidden, n_chars, 1)
    conv1_b = rnd((n_chars,))
    return fc1_w, fc1_b, blocks, conv1_w, conv1_b


if __name__ == "__main__":
    batch, seq_len, n_chars, hidden = 2, 8, 21, 32
    key = jax.random.PRNGKey(0)
    k_noise, k_par, k_gum = jax.random.split(key, 3)

    noise = jax.random.normal(k_noise, (batch, 128), jnp.float32)
    params = init_params(k_par, hidden, seq_len, n_chars)
    # TODO(synk): Gumbel(0,1) noise is pre-sampled here (PyTorch samples it
    # inside F.gumbel_softmax); in-kernel pltpu.prng_* sampling would drop one
    # operand but could not be checked against a deterministic reference.
    gumbel = jax.random.gumbel(k_gum, (batch, seq_len, n_chars), jnp.float32)

    packed = pack_params(params)       # one-time packing, off the per-call path
    y = generator_forward(packed, noise, gumbel)
    y = jax.block_until_ready(y)
    y_ref = generator_ref(noise, gumbel, params)

    assert y.shape == (batch, seq_len, n_chars), y.shape
    if not jnp.allclose(y, y_ref, atol=2e-2, rtol=2e-2):
        err = jnp.max(jnp.abs(y - y_ref))
        raise AssertionError(f"kernel/reference mismatch (max abs err {err})")
    print("KERNEL_OK")
</pallas_src>

<mosaic_0001>
module attributes {stable_mosaic.version = 11 : i64} {
  func.func @generator_kernel(%arg0: memref<2x128xf32, #tpu.memory_space<vmem>>, %arg1: memref<16x21xf32, #tpu.memory_space<vmem>>, %arg2: memref<128x256xbf16, #tpu.memory_space<vmem>>, %arg3: memref<11x96x32xbf16, #tpu.memory_space<vmem>>, %arg4: memref<12x256xf32, #tpu.memory_space<vmem>>, %arg5: memref<16x21xf32, #tpu.memory_space<vmem>>) attributes {dimension_semantics = [], scalar_prefetch = 0 : i64, scratch_operands = 0 : i64, tpu.core_type = #tpu.core_type<tc>} {
    %c0 = arith.constant 0 : index
    %c0_0 = arith.constant 0 : index
    %0 = vector.load %arg0[%c0, %c0_0] : memref<2x128xf32, #tpu.memory_space<vmem>>, vector<2x128xf32>
    %1 = arith.truncf %0 : vector<2x128xf32> to vector<2x128xbf16>
    %c0_1 = arith.constant 0 : index
    %c0_2 = arith.constant 0 : index
    %2 = vector.load %arg2[%c0_1, %c0_2] : memref<128x256xbf16, #tpu.memory_space<vmem>>, vector<128x256xbf16>
    %cst = arith.constant dense<0.000000e+00> : vector<2x256xf32>
    %3 = tpu.matmul %1, %2, %cst {dimension_numbers = #tpu.dot_dimension_numbers<[1], [0], [0], [1], [0, 0, 1, 1], [], []>} : vector<2x128xbf16>, vector<128x256xbf16>, vector<2x256xf32> -> vector<2x256xf32>
    %c0_3 = arith.constant 0 : index
    %c0_4 = arith.constant 0 : index
    %4 = vector.load %arg4[%c0_3, %c0_4] : memref<12x256xf32, #tpu.memory_space<vmem>>, vector<1x256xf32>
    %5 = vector.broadcast %4 : vector<1x256xf32> to vector<2x256xf32>
    %6 = arith.addf %3, %5 : vector<2x256xf32>
    %7 = vector.extract_strided_slice %6 {offsets = [0, 0], sizes = [2, 32], strides = [1, 1]} : vector<2x256xf32> to vector<2x32xf32>
    %8 = vector.extract_strided_slice %6 {offsets = [0, 32], sizes = [2, 32], strides = [1, 1]} : vector<2x256xf32> to vector<2x32xf32>
    %9 = vector.extract_strided_slice %6 {offsets = [0, 64], sizes = [2, 32], strides = [1, 1]} : vector<2x256xf32> to vector<2x32xf32>
    %10 = vector.extract_strided_slice %6 {offsets = [0, 96], sizes = [2, 32], strides = [1, 1]} : vector<2x256xf32> to vector<2x32xf32>
    %11 = vector.extract_strided_slice %6 {offsets = [0, 128], sizes = [2, 32], strides = [1, 1]} : vector<2x256xf32> to vector<2x32xf32>
    %12 = vector.extract_strided_slice %6 {offsets = [0, 160], sizes = [2, 32], strides = [1, 1]} : vector<2x256xf32> to vector<2x32xf32>
    %13 = vector.extract_strided_slice %6 {offsets = [0, 192], sizes = [2, 32], strides = [1, 1]} : vector<2x256xf32> to vector<2x32xf32>
    %14 = vector.extract_strided_slice %6 {offsets = [0, 224], sizes = [2, 32], strides = [1, 1]} : vector<2x256xf32> to vector<2x32xf32>
    %15 = tpu.concatenate %7, %8, %9, %10, %11, %12, %13, %14 in 0 : vector<2x32xf32>, vector<2x32xf32>, vector<2x32xf32>, vector<2x32xf32>, vector<2x32xf32>, vector<2x32xf32>, vector<2x32xf32>, vector<2x32xf32> -> vector<16x32xf32>
    %cst_5 = arith.constant 0.000000e+00 : f32
    %16 = vector.broadcast %cst_5 : f32 to vector<2x32xf32>
    %cst_6 = arith.constant 0.000000e+00 : f32
    %17 = vector.broadcast %cst_6 : f32 to vector<16x32xf32>
    %18 = arith.maximumf %15, %17 : vector<16x32xf32>
    %c0_7 = arith.constant 0 : index
    %c0_8 = arith.constant 0 : index
    %c0_9 = arith.constant 0 : index
    %19 = vector.load %arg3[%c0_7, %c0_8, %c0_9] : memref<11x96x32xbf16, #tpu.memory_space<vmem>>, vector<1x96x32xbf16>
    %20 = vector.shape_cast %19 : vector<1x96x32xbf16> to vector<96x32xbf16>
    %c1 = arith.constant 1 : index
    %c0_10 = arith.constant 0 : index
    %21 = vector.load %arg4[%c1, %c0_10] : memref<12x256xf32, #tpu.memory_space<vmem>>, vector<1x32xf32>
    %22 = vector.extract_strided_slice %18 {offsets = [0, 0], sizes = [14, 32], strides = [1, 1]} : vector<16x32xf32> to vector<14x32xf32>
    %23 = tpu.concatenate %16, %22 in 0 : vector<2x32xf32>, vector<14x32xf32> -> vector<16x32xf32>
    %24 = vector.extract_strided_slice %18 {offsets = [2, 0], sizes = [14, 32], strides = [1, 1]} : vector<16x32xf32> to vector<14x32xf32>
    %25 = tpu.concatenate %24, %16 in 0 : vector<14x32xf32>, vector<2x32xf32> -> vector<16x32xf32>
    %26 = tpu.concatenate %23, %18, %25 in 1 : vector<16x32xf32>, vector<16x32xf32>, vector<16x32xf32> -> vector<16x96xf32>
    %27 = arith.truncf %26 : vector<16x96xf32> to vector<16x96xbf16>
    %cst_11 = arith.constant dense<0.000000e+00> : vector<16x32xf32>
    %28 = tpu.matmul %27, %20, %cst_11 {dimension_numbers = #tpu.dot_dimension_numbers<[1], [0], [0], [1], [0, 0, 1, 1], [], []>} : vector<16x96xbf16>, vector<96x32xbf16>, vector<16x32xf32> -> vector<16x32xf32>
    %29 = vector.broadcast %21 : vector<1x32xf32> to vector<16x32xf32>
    %30 = arith.addf %28, %29 : vector<16x32xf32>
    %cst_12 = arith.constant 0.000000e+00 : f32
    %31 = vector.broadcast %cst_12 : f32 to vector<16x32xf32>
    %32 = arith.maximumf %30, %31 : vector<16x32xf32>
    %c1_13 = arith.constant 1 : index
    %c0_14 = arith.constant 0 : index
    %c0_15 = arith.constant 0 : index
    %33 = vector.load %arg3[%c1_13, %c0_14, %c0_15] : memref<11x96x32xbf16, #tpu.memory_space<vmem>>, vector<1x96x32xbf16>
    %34 = vector.shape_cast %33 : vector<1x96x32xbf16> to vector<96x32xbf16>
    %c2 = arith.constant 2 : index
    %c0_16 = arith.constant 0 : index
    %35 = vector.load %arg4[%c2, %c0_16] : memref<12x256xf32, #tpu.memory_space<vmem>>, vector<1x32xf32>
    %36 = vector.extract_strided_slice %32 {offsets = [0, 0], sizes = [14, 32], strides = [1, 1]} : vector<16x32xf32> to vector<14x32xf32>
    %37 = tpu.concatenate %16, %36 in 0 : vector<2x32xf32>, vector<14x32xf32> -> vector<16x32xf32>
    %38 = vector.extract_strided_slice %32 {offsets = [2, 0], sizes = [14, 32], strides = [1, 1]} : vector<16x32xf32> to vector<14x32xf32>
    %39 = tpu.concatenate %38, %16 in 0 : vector<14x32xf32>, vector<2x32xf32> -> vector<16x32xf32>
    %40 = tpu.concatenate %37, %32, %39 in 1 : vector<16x32xf32>, vector<16x32xf32>, vector<16x32xf32> -> vector<16x96xf32>
    %41 = arith.truncf %40 : vector<16x96xf32> to vector<16x96xbf16>
    %cst_17 = arith.constant dense<0.000000e+00> : vector<16x32xf32>
    %42 = tpu.matmul %41, %34, %cst_17 {dimension_numbers = #tpu.dot_dimension_numbers<[1], [0], [0], [1], [0, 0, 1, 1], [], []>} : vector<16x96xbf16>, vector<96x32xbf16>, vector<16x32xf32> -> vector<16x32xf32>
    %43 = vector.broadcast %35 : vector<1x32xf32> to vector<16x32xf32>
    %44 = arith.addf %42, %43 : vector<16x32xf32>
    %cst_18 = arith.constant 3.000000e-01 : f32
    %45 = vector.broadcast %cst_18 : f32 to vector<16x32xf32>
    %46 = arith.mulf %45, %44 : vector<16x32xf32>
    %47 = arith.addf %15, %46 : vector<16x32xf32>
    %cst_19 = arith.constant 0.000000e+00 : f32
    %48 = vector.broadcast %cst_19 : f32 to vector<16x32xf32>
    %49 = arith.maximumf %47, %48 : vector<16x32xf32>
    %c2_20 = arith.constant 2 : index
    %c0_21 = arith.constant 0 : index
    %c0_22 = arith.constant 0 : index
    %50 = vector.load %arg3[%c2_20, %c0_21, %c0_22] : memref<11x96x32xbf16, #tpu.memory_space<vmem>>, vector<1x96x32xbf16>
    %51 = vector.shape_cast %50 : vector<1x96x32xbf16> to vector<96x32xbf16>
    %c3 = arith.constant 3 : index
    %c0_23 = arith.constant 0 : index
    %52 = vector.load %arg4[%c3, %c0_23] : memref<12x256xf32, #tpu.memory_space<vmem>>, vector<1x32xf32>
    %53 = vector.extract_strided_slice %49 {offsets = [0, 0], sizes = [14, 32], strides = [1, 1]} : vector<16x32xf32> to vector<14x32xf32>
    %54 = tpu.concatenate %16, %53 in 0 : vector<2x32xf32>, vector<14x32xf32> -> vector<16x32xf32>
    %55 = vector.extract_strided_slice %49 {offsets = [2, 0], sizes = [14, 32], strides = [1, 1]} : vector<16x32xf32> to vector<14x32xf32>
    %56 = tpu.concatenate %55, %16 in 0 : vector<14x32xf32>, vector<2x32xf32> -> vector<16x32xf32>
    %57 = tpu.concatenate %54, %49, %56 in 1 : vector<16x32xf32>, vector<16x32xf32>, vector<16x32xf32> -> vector<16x96xf32>
    %58 = arith.truncf %57 : vector<16x96xf32> to vector<16x96xbf16>
    %cst_24 = arith.constant dense<0.000000e+00> : vector<16x32xf32>
    %59 = tpu.matmul %58, %51, %cst_24 {dimension_numbers = #tpu.dot_dimension_numbers<[1], [0], [0], [1], [0, 0, 1, 1], [], []>} : vector<16x96xbf16>, vector<96x32xbf16>, vector<16x32xf32> -> vector<16x32xf32>
    %60 = vector.broadcast %52 : vector<1x32xf32> to vector<16x32xf32>
    %61 = arith.addf %59, %60 : vector<16x32xf32>
    %cst_25 = arith.constant 0.000000e+00 : f32
    %62 = vector.broadcast %cst_25 : f32 to vector<16x32xf32>
    %63 = arith.maximumf %61, %62 : vector<16x32xf32>
    %c3_26 = arith.constant 3 : index
    %c0_27 = arith.constant 0 : index
    %c0_28 = arith.constant 0 : index
    %64 = vector.load %arg3[%c3_26, %c0_27, %c0_28] : memref<11x96x32xbf16, #tpu.memory_space<vmem>>, vector<1x96x32xbf16>
    %65 = vector.shape_cast %64 : vector<1x96x32xbf16> to vector<96x32xbf16>
    %c4 = arith.constant 4 : index
    %c0_29 = arith.constant 0 : index
    %66 = vector.load %arg4[%c4, %c0_29] : memref<12x256xf32, #tpu.memory_space<vmem>>, vector<1x32xf32>
    %67 = vector.extract_strided_slice %63 {offsets = [0, 0], sizes = [14, 32], strides = [1, 1]} : vector<16x32xf32> to vector<14x32xf32>
    %68 = tpu.concatenate %16, %67 in 0 : vector<2x32xf32>, vector<14x32xf32> -> vector<16x32xf32>
    %69 = vector.extract_strided_slice %63 {offsets = [2, 0], sizes = [14, 32], strides = [1, 1]} : vector<16x32xf32> to vector<14x32xf32>
    %70 = tpu.concatenate %69, %16 in 0 : vector<14x32xf32>, vector<2x32xf32> -> vector<16x32xf32>
    %71 = tpu.concatenate %68, %63, %70 in 1 : vector<16x32xf32>, vector<16x32xf32>, vector<16x32xf32> -> vector<16x96xf32>
    %72 = arith.truncf %71 : vector<16x96xf32> to vector<16x96xbf16>
    %cst_30 = arith.constant dense<0.000000e+00> : vector<16x32xf32>
    %73 = tpu.matmul %72, %65, %cst_30 {dimension_numbers = #tpu.dot_dimension_numbers<[1], [0], [0], [1], [0, 0, 1, 1], [], []>} : vector<16x96xbf16>, vector<96x32xbf16>, vector<16x32xf32> -> vector<16x32xf32>
    %74 = vector.broadcast %66 : vector<1x32xf32> to vector<16x32xf32>
    %75 = arith.addf %73, %74 : vector<16x32xf32>
    %cst_31 = arith.constant 3.000000e-01 : f32
    %76 = vector.broadcast %cst_31 : f32 to vector<16x32xf32>
    %77 = arith.mulf %76, %75 : vector<16x32xf32>
    %78 = arith.addf %47, %77 : vector<16x32xf32>
    %cst_32 = arith.constant 0.000000e+00 : f32
    %79 = vector.broadcast %cst_32 : f32 to vector<16x32xf32>
    %80 = arith.maximumf %78, %79 : vector<16x32xf32>
    %c4_33 = arith.constant 4 : index
    %c0_34 = arith.constant 0 : index
    %c0_35 = arith.constant 0 : index
    %81 = vector.load %arg3[%c4_33, %c0_34, %c0_35] : memref<11x96x32xbf16, #tpu.memory_space<vmem>>, vector<1x96x32xbf16>
    %82 = vector.shape_cast %81 : vector<1x96x32xbf16> to vector<96x32xbf16>
    %c5 = arith.constant 5 : index
    %c0_36 = arith.constant 0 : index
    %83 = vector.load %arg4[%c5, %c0_36] : memref<12x256xf32, #tpu.memory_space<vmem>>, vector<1x32xf32>
    %84 = vector.extract_strided_slice %80 {offsets = [0, 0], sizes = [14, 32], strides = [1, 1]} : vector<16x32xf32> to vector<14x32xf32>
    %85 = tpu.concatenate %16, %84 in 0 : vector<2x32xf32>, vector<14x32xf32> -> vector<16x32xf32>
    %86 = vector.extract_strided_slice %80 {offsets = [2, 0], sizes = [14, 32], strides = [1, 1]} : vector<16x32xf32> to vector<14x32xf32>
    %87 = tpu.concatenate %86, %16 in 0 : vector<14x32xf32>, vector<2x32xf32> -> vector<16x32xf32>
    %88 = tpu.concatenate %85, %80, %87 in 1 : vector<16x32xf32>, vector<16x32xf32>, vector<16x32xf32> -> vector<16x96xf32>
    %89 = arith.truncf %88 : vector<16x96xf32> to vector<16x96xbf16>
    %cst_37 = arith.constant dense<0.000000e+00> : vector<16x32xf32>
    %90 = tpu.matmul %89, %82, %cst_37 {dimension_numbers = #tpu.dot_dimension_numbers<[1], [0], [0], [1], [0, 0, 1, 1], [], []>} : vector<16x96xbf16>, vector<96x32xbf16>, vector<16x32xf32> -> vector<16x32xf32>
    %91 = vector.broadcast %83 : vector<1x32xf32> to vector<16x32xf32>
    %92 = arith.addf %90, %91 : vector<16x32xf32>
    %cst_38 = arith.constant 0.000000e+00 : f32
    %93 = vector.broadcast %cst_38 : f32 to vector<16x32xf32>
    %94 = arith.maximumf %92, %93 : vector<16x32xf32>
    %c5_39 = arith.constant 5 : index
    %c0_40 = arith.constant 0 : index
    %c0_41 = arith.constant 0 : index
    %95 = vector.load %arg3[%c5_39, %c0_40, %c0_41] : memref<11x96x32xbf16, #tpu.memory_space<vmem>>, vector<1x96x32xbf16>
    %96 = vector.shape_cast %95 : vector<1x96x32xbf16> to vector<96x32xbf16>
    %c6 = arith.constant 6 : index
    %c0_42 = arith.constant 0 : index
    %97 = vector.load %arg4[%c6, %c0_42] : memref<12x256xf32, #tpu.memory_space<vmem>>, vector<1x32xf32>
    %98 = vector.extract_strided_slice %94 {offsets = [0, 0], sizes = [14, 32], strides = [1, 1]} : vector<16x32xf32> to vector<14x32xf32>
    %99 = tpu.concatenate %16, %98 in 0 : vector<2x32xf32>, vector<14x32xf32> -> vector<16x32xf32>
    %100 = vector.extract_strided_slice %94 {offsets = [2, 0], sizes = [14, 32], strides = [1, 1]} : vector<16x32xf32> to vector<14x32xf32>
    %101 = tpu.concatenate %100, %16 in 0 : vector<14x32xf32>, vector<2x32xf32> -> vector<16x32xf32>
    %102 = tpu.concatenate %99, %94, %101 in 1 : vector<16x32xf32>, vector<16x32xf32>, vector<16x32xf32> -> vector<16x96xf32>
    %103 = arith.truncf %102 : vector<16x96xf32> to vector<16x96xbf16>
    %cst_43 = arith.constant dense<0.000000e+00> : vector<16x32xf32>
    %104 = tpu.matmul %103, %96, %cst_43 {dimension_numbers = #tpu.dot_dimension_numbers<[1], [0], [0], [1], [0, 0, 1, 1], [], []>} : vector<16x96xbf16>, vector<96x32xbf16>, vector<16x32xf32> -> vector<16x32xf32>
    %105 = vector.broadcast %97 : vector<1x32xf32> to vector<16x32xf32>
    %106 = arith.addf %104, %105 : vector<16x32xf32>
    %cst_44 = arith.constant 3.000000e-01 : f32
    %107 = vector.broadcast %cst_44 : f32 to vector<16x32xf32>
    %108 = arith.mulf %107, %106 : vector<16x32xf32>
    %109 = arith.addf %78, %108 : vector<16x32xf32>
    %cst_45 = arith.constant 0.000000e+00 : f32
    %110 = vector.broadcast %cst_45 : f32 to vector<16x32xf32>
    %111 = arith.maximumf %109, %110 : vector<16x32xf32>
    %c6_46 = arith.constant 6 : index
    %c0_47 = arith.constant 0 : index
    %c0_48 = arith.constant 0 : index
    %112 = vector.load %arg3[%c6_46, %c0_47, %c0_48] : memref<11x96x32xbf16, #tpu.memory_space<vmem>>, vector<1x96x32xbf16>
    %113 = vector.shape_cast %112 : vector<1x96x32xbf16> to vector<96x32xbf16>
    %c7 = arith.constant 7 : index
    %c0_49 = arith.constant 0 : index
    %114 = vector.load %arg4[%c7, %c0_49] : memref<12x256xf32, #tpu.memory_space<vmem>>, vector<1x32xf32>
    %115 = vector.extract_strided_slice %111 {offsets = [0, 0], sizes = [14, 32], strides = [1, 1]} : vector<16x32xf32> to vector<14x32xf32>
    %116 = tpu.concatenate %16, %115 in 0 : vector<2x32xf32>, vector<14x32xf32> -> vector<16x32xf32>
    %117 = vector.extract_strided_slice %111 {offsets = [2, 0], sizes = [14, 32], strides = [1, 1]} : vector<16x32xf32> to vector<14x32xf32>
    %118 = tpu.concatenate %117, %16 in 0 : vector<14x32xf32>, vector<2x32xf32> -> vector<16x32xf32>
    %119 = tpu.concatenate %116, %111, %118 in 1 : vector<16x32xf32>, vector<16x32xf32>, vector<16x32xf32> -> vector<16x96xf32>
    %120 = arith.truncf %119 : vector<16x96xf32> to vector<16x96xbf16>
    %cst_50 = arith.constant dense<0.000000e+00> : vector<16x32xf32>
    %121 = tpu.matmul %120, %113, %cst_50 {dimension_numbers = #tpu.dot_dimension_numbers<[1], [0], [0], [1], [0, 0, 1, 1], [], []>} : vector<16x96xbf16>, vector<96x32xbf16>, vector<16x32xf32> -> vector<16x32xf32>
    %122 = vector.broadcast %114 : vector<1x32xf32> to vector<16x32xf32>
    %123 = arith.addf %121, %122 : vector<16x32xf32>
    %cst_51 = arith.constant 0.000000e+00 : f32
    %124 = vector.broadcast %cst_51 : f32 to vector<16x32xf32>
    %125 = arith.maximumf %123, %124 : vector<16x32xf32>
    %c7_52 = arith.constant 7 : index
    %c0_53 = arith.constant 0 : index
    %c0_54 = arith.constant 0 : index
    %126 = vector.load %arg3[%c7_52, %c0_53, %c0_54] : memref<11x96x32xbf16, #tpu.memory_space<vmem>>, vector<1x96x32xbf16>
    %127 = vector.shape_cast %126 : vector<1x96x32xbf16> to vector<96x32xbf16>
    %c8 = arith.constant 8 : index
    %c0_55 = arith.constant 0 : index
    %128 = vector.load %arg4[%c8, %c0_55] : memref<12x256xf32, #tpu.memory_space<vmem>>, vector<1x32xf32>
    %129 = vector.extract_strided_slice %125 {offsets = [0, 0], sizes = [14, 32], strides = [1, 1]} : vector<16x32xf32> to vector<14x32xf32>
    %130 = tpu.concatenate %16, %129 in 0 : vector<2x32xf32>, vector<14x32xf32> -> vector<16x32xf32>
    %131 = vector.extract_strided_slice %125 {offsets = [2, 0], sizes = [14, 32], strides = [1, 1]} : vector<16x32xf32> to vector<14x32xf32>
    %132 = tpu.concatenate %131, %16 in 0 : vector<14x32xf32>, vector<2x32xf32> -> vector<16x32xf32>
    %133 = tpu.concatenate %130, %125, %132 in 1 : vector<16x32xf32>, vector<16x32xf32>, vector<16x32xf32> -> vector<16x96xf32>
    %134 = arith.truncf %133 : vector<16x96xf32> to vector<16x96xbf16>
    %cst_56 = arith.constant dense<0.000000e+00> : vector<16x32xf32>
    %135 = tpu.matmul %134, %127, %cst_56 {dimension_numbers = #tpu.dot_dimension_numbers<[1], [0], [0], [1], [0, 0, 1, 1], [], []>} : vector<16x96xbf16>, vector<96x32xbf16>, vector<16x32xf32> -> vector<16x32xf32>
    %136 = vector.broadcast %128 : vector<1x32xf32> to vector<16x32xf32>
    %137 = arith.addf %135, %136 : vector<16x32xf32>
    %cst_57 = arith.constant 3.000000e-01 : f32
    %138 = vector.broadcast %cst_57 : f32 to vector<16x32xf32>
    %139 = arith.mulf %138, %137 : vector<16x32xf32>
    %140 = arith.addf %109, %139 : vector<16x32xf32>
    %cst_58 = arith.constant 0.000000e+00 : f32
    %141 = vector.broadcast %cst_58 : f32 to vector<16x32xf32>
    %142 = arith.maximumf %140, %141 : vector<16x32xf32>
    %c8_59 = arith.constant 8 : index
    %c0_60 = arith.constant 0 : index
    %c0_61 = arith.constant 0 : index
    %143 = vector.load %arg3[%c8_59, %c0_60, %c0_61] : memref<11x96x32xbf16, #tpu.memory_space<vmem>>, vector<1x96x32xbf16>
    %144 = vector.shape_cast %143 : vector<1x96x32xbf16> to vector<96x32xbf16>
    %c9 = arith.constant 9 : index
    %c0_62 = arith.constant 0 : index
    %145 = vector.load %arg4[%c9, %c0_62] : memref<12x256xf32, #tpu.memory_space<vmem>>, vector<1x32xf32>
    %146 = vector.extract_strided_slice %142 {offsets = [0, 0], sizes = [14, 32], strides = [1, 1]} : vector<16x32xf32> to vector<14x32xf32>
    %147 = tpu.concatenate %16, %146 in 0 : vector<2x32xf32>, vector<14x32xf32> -> vector<16x32xf32>
    %148 = vector.extract_strided_slice %142 {offsets = [2, 0], sizes = [14, 32], strides = [1, 1]} : vector<16x32xf32> to vector<14x32xf32>
    %149 = tpu.concatenate %148, %16 in 0 : vector<14x32xf32>, vector<2x32xf32> -> vector<16x32xf32>
    %150 = tpu.concatenate %147, %142, %149 in 1 : vector<16x32xf32>, vector<16x32xf32>, vector<16x32xf32> -> vector<16x96xf32>
    %151 = arith.truncf %150 : vector<16x96xf32> to vector<16x96xbf16>
    %cst_63 = arith.constant dense<0.000000e+00> : vector<16x32xf32>
    %152 = tpu.matmul %151, %144, %cst_63 {dimension_numbers = #tpu.dot_dimension_numbers<[1], [0], [0], [1], [0, 0, 1, 1], [], []>} : vector<16x96xbf16>, vector<96x32xbf16>, vector<16x32xf32> -> vector<16x32xf32>
    %153 = vector.broadcast %145 : vector<1x32xf32> to vector<16x32xf32>
    %154 = arith.addf %152, %153 : vector<16x32xf32>
    %cst_64 = arith.constant 0.000000e+00 : f32
    %155 = vector.broadcast %cst_64 : f32 to vector<16x32xf32>
    %156 = arith.maximumf %154, %155 : vector<16x32xf32>
    %c9_65 = arith.constant 9 : index
    %c0_66 = arith.constant 0 : index
    %c0_67 = arith.constant 0 : index
    %157 = vector.load %arg3[%c9_65, %c0_66, %c0_67] : memref<11x96x32xbf16, #tpu.memory_space<vmem>>, vector<1x96x32xbf16>
    %158 = vector.shape_cast %157 : vector<1x96x32xbf16> to vector<96x32xbf16>
    %c10 = arith.constant 10 : index
    %c0_68 = arith.constant 0 : index
    %159 = vector.load %arg4[%c10, %c0_68] : memref<12x256xf32, #tpu.memory_space<vmem>>, vector<1x32xf32>
    %160 = vector.extract_strided_slice %156 {offsets = [0, 0], sizes = [14, 32], strides = [1, 1]} : vector<16x32xf32> to vector<14x32xf32>
    %161 = tpu.concatenate %16, %160 in 0 : vector<2x32xf32>, vector<14x32xf32> -> vector<16x32xf32>
    %162 = vector.extract_strided_slice %156 {offsets = [2, 0], sizes = [14, 32], strides = [1, 1]} : vector<16x32xf32> to vector<14x32xf32>
    %163 = tpu.concatenate %162, %16 in 0 : vector<14x32xf32>, vector<2x32xf32> -> vector<16x32xf32>
    %164 = tpu.concatenate %161, %156, %163 in 1 : vector<16x32xf32>, vector<16x32xf32>, vector<16x32xf32> -> vector<16x96xf32>
    %165 = arith.truncf %164 : vector<16x96xf32> to vector<16x96xbf16>
    %cst_69 = arith.constant dense<0.000000e+00> : vector<16x32xf32>
    %166 = tpu.matmul %165, %158, %cst_69 {dimension_numbers = #tpu.dot_dimension_numbers<[1], [0], [0], [1], [0, 0, 1, 1], [], []>} : vector<16x96xbf16>, vector<96x32xbf16>, vector<16x32xf32> -> vector<16x32xf32>
    %167 = vector.broadcast %159 : vector<1x32xf32> to vector<16x32xf32>
    %168 = arith.addf %166, %167 : vector<16x32xf32>
    %cst_70 = arith.constant 3.000000e-01 : f32
    %169 = vector.broadcast %cst_70 : f32 to vector<16x32xf32>
    %170 = arith.mulf %169, %168 : vector<16x32xf32>
    %171 = arith.addf %140, %170 : vector<16x32xf32>
    %172 = vector.extract_strided_slice %171 {offsets = [0, 0], sizes = [1, 32], strides = [1, 1]} : vector<16x32xf32> to vector<1x32xf32>
    %173 = vector.extract_strided_slice %171 {offsets = [2, 0], sizes = [1, 32], strides = [1, 1]} : vector<16x32xf32> to vector<1x32xf32>
    %174 = vector.extract_strided_slice %171 {offsets = [4, 0], sizes = [1, 32], strides = [1, 1]} : vector<16x32xf32> to vector<1x32xf32>
    %175 = vector.extract_strided_slice %171 {offsets = [6, 0], sizes = [1, 32], strides = [1, 1]} : vector<16x32xf32> to vector<1x32xf32>
    %176 = vector.extract_strided_slice %171 {offsets = [8, 0], sizes = [1, 32], strides = [1, 1]} : vector<16x32xf32> to vector<1x32xf32>
    %177 = vector.extract_strided_slice %171 {offsets = [10, 0], sizes = [1, 32], strides = [1, 1]} : vector<16x32xf32> to vector<1x32xf32>
    %178 = vector.extract_strided_slice %171 {offsets = [12, 0], sizes = [1, 32], strides = [1, 1]} : vector<16x32xf32> to vector<1x32xf32>
    %179 = vector.extract_strided_slice %171 {offsets = [14, 0], sizes = [1, 32], strides = [1, 1]} : vector<16x32xf32> to vector<1x32xf32>
    %180 = vector.extract_strided_slice %171 {offsets = [1, 0], sizes = [1, 32], strides = [1, 1]} : vector<16x32xf32> to vector<1x32xf32>
    %181 = vector.extract_strided_slice %171 {offsets = [3, 0], sizes = [1, 32], strides = [1, 1]} : vector<16x32xf32> to vector<1x32xf32>
    %182 = vector.extract_strided_slice %171 {offsets = [5, 0], sizes = [1, 32], strides = [1, 1]} : vector<16x32xf32> to vector<1x32xf32>
    %183 = vector.extract_strided_slice %171 {offsets = [7, 0], sizes = [1, 32], strides = [1, 1]} : vector<16x32xf32> to vector<1x32xf32>
    %184 = vector.extract_strided_slice %171 {offsets = [9, 0], sizes = [1, 32], strides = [1, 1]} : vector<16x32xf32> to vector<1x32xf32>
    %185 = vector.extract_strided_slice %171 {offsets = [11, 0], sizes = [1, 32], strides = [1, 1]} : vector<16x32xf32> to vector<1x32xf32>
    %186 = vector.extract_strided_slice %171 {offsets = [13, 0], sizes = [1, 32], strides = [1, 1]} : vector<16x32xf32> to vector<1x32xf32>
    %187 = vector.extract_strided_slice %171 {offsets = [15, 0], sizes = [1, 32], strides = [1, 1]} : vector<16x32xf32> to vector<1x32xf32>
    %188 = tpu.concatenate %172, %173, %174, %175, %176, %177, %178, %179, %180, %181, %182, %183, %184, %185, %186, %187 in 0 : vector<1x32xf32>, vector<1x32xf32>, vector<1x32xf32>, vector<1x32xf32>, vector<1x32xf32>, vector<1x32xf32>, vector<1x32xf32>, vector<1x32xf32>, vector<1x32xf32>, vector<1x32xf32>, vector<1x32xf32>, vector<1x32xf32>, vector<1x32xf32>, vector<1x32xf32>, vector<1x32xf32>, vector<1x32xf32> -> vector<16x32xf32>
    %c10_71 = arith.constant 10 : index
    %c0_72 = arith.constant 0 : index
    %c0_73 = arith.constant 0 : index
    %189 = vector.load %arg3[%c10_71, %c0_72, %c0_73] : memref<11x96x32xbf16, #tpu.memory_space<vmem>>, vector<1x96x32xbf16>
    %190 = vector.shape_cast %189 : vector<1x96x32xbf16> to vector<96x32xbf16>
    %191 = vector.extract_strided_slice %190 {offsets = [0, 0], sizes = [32, 21], strides = [1, 1]} : vector<96x32xbf16> to vector<32x21xbf16>
    %c11 = arith.constant 11 : index
    %c0_74 = arith.constant 0 : index
    %192 = vector.load %arg4[%c11, %c0_74] : memref<12x256xf32, #tpu.memory_space<vmem>>, vector<1x21xf32>
    %193 = arith.truncf %188 : vector<16x32xf32> to vector<16x32xbf16>
    %cst_75 = arith.constant dense<0.000000e+00> : vector<16x21xf32>
    %194 = tpu.matmul %193, %191, %cst_75 {dimension_numbers = #tpu.dot_dimension_numbers<[1], [0], [0], [1], [0, 0, 1, 1], [], []>} : vector<16x32xbf16>, vector<32x21xbf16>, vector<16x21xf32> -> vector<16x21xf32>
    %195 = vector.broadcast %192 : vector<1x21xf32> to vector<16x21xf32>
    %196 = arith.addf %194, %195 : vector<16x21xf32>
    %c0_76 = arith.constant 0 : index
    %c0_77 = arith.constant 0 : index
    %197 = vector.load %arg1[%c0_76, %c0_77] : memref<16x21xf32, #tpu.memory_space<vmem>>, vector<16x21xf32>
    %198 = arith.addf %196, %197 : vector<16x21xf32>
    %cst_78 = arith.constant 1.33333337 : f32
    %199 = vector.broadcast %cst_78 : f32 to vector<16x21xf32>
    %200 = arith.mulf %198, %199 : vector<16x21xf32>
    %cst_79 = arith.constant dense<0xFF800000> : vector<16xf32>
    %201 = vector.multi_reduction <maximumf>, %200, %cst_79 [1] : vector<16x21xf32> to vector<16xf32>
    %202 = vector.shape_cast %201 : vector<16xf32> to vector<16x1xf32>
    %203 = vector.broadcast %202 : vector<16x1xf32> to vector<16x21xf32>
    %204 = arith.subf %200, %203 : vector<16x21xf32>
    %205 = math.exp %204 : vector<16x21xf32>
    %cst_80 = arith.constant dense<0.000000e+00> : vector<16xf32>
    %206 = vector.multi_reduction <add>, %205, %cst_80 [1] : vector<16x21xf32> to vector<16xf32>
    %207 = vector.shape_cast %206 : vector<16xf32> to vector<16x1xf32>
    %208 = tpu.reciprocal %207 {approx = true} : vector<16x1xf32> -> vector<16x1xf32>
    %209 = vector.broadcast %208 : vector<16x1xf32> to vector<16x21xf32>
    %210 = arith.mulf %205, %209 : vector<16x21xf32>
    %c0_81 = arith.constant 0 : index
    %c0_82 = arith.constant 0 : index
    %211 = vector.load %arg5[%c0_81, %c0_82] : memref<16x21xf32, #tpu.memory_space<vmem>>, vector<16x21xf32>
    tpu.vector_store %arg5[%c0_81, %c0_82], %210 {strides = array<i32>} : memref<16x21xf32, #tpu.memory_space<vmem>>, vector<16x21xf32>,
    return
  }
}

</mosaic_0001>

<bundles_post_ra>
// kernel: generator_forward.1
= control target key start
LH: loop header
LB: loop body
LE: loop exit
PB: predicated region body
PF: predicated region fallthrough
CT: control target
= control target key end

     0   :  { %v2315_v2 = vmov 0   ;;  %s2902_s0 = inlined_call_operand.vmem [shape: f32[2,128], index: 0, kind: input, shape index: {}]   ;;  %s2903_s1 = inlined_call_operand.vmem [shape: f32[16,21], index: 1, kind: input, shape index: {}]   ;;  %s2904_s2 = inlined_call_operand.vmem [shape: bf16[128,256], index: 2, kind: input, shape index: {}]   ;;  %s2905_s3 = inlined_call_operand.vmem [shape: bf16[11,96,32], index: 3, kind: input, shape index: {}]   ;;  %s2906_s4 = inlined_call_operand.vmem [shape: f32[12,256], index: 4, kind: input, shape index: {}]   ;;  %s2907_s5 = inlined_call_operand.hbm [shape: f32[16,21], index: 5, kind: output, shape index: {}]  }
   0x1   :  { %v2197_v0 = vld [vmem:[%s2904_s2 + $0x4] ss:$8 sps:$4 sm:$0xff]   ;;  %v2199_v1 = vld [vmem:[%s2904_s2] ss:$8 sps:$4 sm:$0xff]   ;;  %164 = vmatprep.mubr.bf16.mxu0 %v2315_v2  ;;  %v2200_v3 = vld [vmem:[%s2904_s2 + $0x14] ss:$8 sps:$4 sm:$0xff]  }
   0x2   :  { %132 = vmatprep.subr.bf16.mxu0 %v2197_v0  ;;  %v2202_v4 = vld [vmem:[%s2904_s2 + $0x10] ss:$8 sps:$4 sm:$0xff]   ;;  %v2203_v5 = vld [vmem:[%s2904_s2 + $0x24] ss:$8 sps:$4 sm:$0xff]   ;;  %v2205_v6 = vld [vmem:[%s2904_s2 + $0x20] ss:$8 sps:$4 sm:$0xff]  }
   0x3   :  { %133 = vmatpush1.bf16.msra.mxu0 %v2199_v1  ;;  %v2206_v7 = vld [vmem:[%s2904_s2 + $0x34] ss:$8 sps:$4 sm:$0xff]   ;;  %v2208_v8 = vld [vmem:[%s2904_s2 + $0x30] ss:$8 sps:$4 sm:$0xff]   ;;  %v2209_v9 = vld [vmem:[%s2904_s2 + $0x44] ss:$8 sps:$4 sm:$0xff]  }
   0x4   :  { %134 = vmatprep.subr.bf16.mxu0 %v2200_v3  ;;  %v2211_v10 = vld [vmem:[%s2904_s2 + $0x40] ss:$8 sps:$4 sm:$0xff]   ;;  %v2212_v11 = vld [vmem:[%s2904_s2 + $0x54] ss:$8 sps:$4 sm:$0xff]   ;;  %v2214_v12 = vld [vmem:[%s2904_s2 + $0x50] ss:$8 sps:$4 sm:$0xff]  }
   0x5   :  { %v2215_v13 = vld [vmem:[%s2904_s2 + $0x64] ss:$8 sps:$4 sm:$0xff]   ;;  %v2217_v14 = vld [vmem:[%s2904_s2 + $0x60] ss:$8 sps:$4 sm:$0xff]   ;;  %v2218_v15 = vld [vmem:[%s2904_s2 + $0x74] ss:$8 sps:$4 sm:$0xff]  }
   0x6   :  { %v2220_v16 = vld [vmem:[%s2904_s2 + $0x70] ss:$8 sps:$4 sm:$0xff]   ;;  %v22_v17 = vld [vmem:[%s2902_s0] sm:$0x3] }
   0x7   :  { %135 = vmatpush1.bf16.msra.mxu0 %v2202_v4  ;;  %v23_v18 = vpack.c.bf16 %v22_v17, %v22_v17 }
   0x8   :  { %136 = vmatprep.subr.bf16.mxu0 %v2203_v5 }
   0xb   :  { %137 = vmatpush1.bf16.msra.mxu0 %v2205_v6 }
   0xc   :  { %138 = vmatprep.subr.bf16.mxu0 %v2206_v7 }
   0xf   :  { %139 = vmatpush1.bf16.msra.mxu0 %v2208_v8 }
  0x10   :  { %140 = vmatprep.subr.bf16.mxu0 %v2209_v9 }
  0x13   :  { %141 = vmatpush1.bf16.msra.mxu0 %v2211_v10 }
  0x14   :  { %142 = vmatprep.subr.bf16.mxu0 %v2212_v11 }
  0x17   :  { %143 = vmatpush1.bf16.msra.mxu0 %v2214_v12 }
  0x18   :  { %144 = vmatprep.subr.bf16.mxu0 %v2215_v13 }
  0x1b   :  { %145 = vmatpush1.bf16.msra.mxu0 %v2217_v14 }
  0x1c   :  { %146 = vmatprep.subr.bf16.mxu0 %v2218_v15 }
  0x1f   :  { %147 = vmatpush1.bf16.msra.mxu0 %v2220_v16 }
  0x22   :  { %165 = vmatmul.mubr.bf16.vlgmr.msra.gmra.mrb[0].mxu0 %v23_v18 }
  0x23   :  { %10 = vsyncpa [#allocation3], 0  ;;  %v42_v19 = vlaneseq  ;;  %v40_v22 = vld [vmem:[%s2906_s4] ss:$8 sm:$0x3]  ;;  %s2316_s0 = smov 64  }
  0x24   :  { %s2317_s2 = smov 96   ;;  %v2221_v36 = vld [vmem:[%s2905_s3] sm:$0xff]   ;;  %v2318_v37 = vmov 0.0   ;;  %v2222_v40 = vld [vmem:[%s2905_s3 + $0x8] sm:$0xff]   ;;  %s2319_s8 = smov 32   ;;  %v2223_v41 = vld [vmem:[%s2905_s3 + $0x10] sm:$0xff]  }
  0x25   :  { %v43_v20 = vshrl.u32 %v42_v19, 7  ;;  %1920 = vmatprep.subr.bf16.mxu1 %v2318_v37  ;;  %1952 = vmatprep.subr.bf16.mxu0 %v2318_v37  ;;  %v2224_v42 = vld [vmem:[%s2905_s3 + $0x18] sm:$0xff]   ;;  %v2225_v45 = vld [vmem:[%s2905_s3 + $0x20] sm:$0xff]   ;;  %vm199_vm0 = vcmask 1041408   ;;  %vm201_vm1 = vcmask 1043456   ;;  %v2226_v50 = vld [vmem:[%s2905_s3 + $0x28] sm:$0xff]  }
  0x26   :  { %1921 = vmatpush3.bf16.msra.mxu1 %v2221_v36  ;;  %vm203_vm2 = vcmask 1045504   ;;  %vm2320_vm3 = vmmov 0   ;;  %vm249_vm4 = vcmask 261120   ;;  %vm252_vm5 = vcmask 523264   ;;  %v2227_v16 = vld [vmem:[%s2905_s3 + $0x30] sm:$0xff]   ;;  %v2228_v17 = vld [vmem:[%s2905_s3 + $0x38] sm:$0xff]  }
  0x27   :  { %v44_v21 = vsub.s32 0, %v43_v20  ;;  %v48_v23 = vsub.s32 1, %v43_v20  ;;  %1922 = vmatprep.subr.bf16.mxu1 %v2318_v37  ;;  %1932 = vmatprep.mubr.msk.bf16.mxu1 %vm2320_vm3, %v2318_v37  ;;  %vm292_vm6 = vcmask 785408   ;;  %v2229_v18 = vld [vmem:[%s2905_s3 + $0x40] sm:$0xff]   ;;  %v2230_v19 = vld [vmem:[%s2905_s3 + $0x48] sm:$0xff]   ;;  %v2231_v20 = vld [vmem:[%s2905_s3 + $0x50] sm:$0xff]  }
  0x28   :  { %1964 = vmatprep.mubr.msk.bf16.mxu0 %vm2320_vm3, %v2318_v37  ;;  %vm1518_vm7 = vcmask 1040384   ;;  %vm1521_vm8 = vcmask 1042432   ;;  %vm1524_vm9 = vcmask 1044480   ;;  %vm1527_vm10 = vcmask 1046528  }
  0x29   :  { %v45_v24 = vrot.slane %v40_v22, %v44_v21  ;;  %v49_v25 = vrot.slane %v40_v22, %v48_v23  ;;  %v222_v21 = vld [vmem:[%s2906_s4 + $0x1] ss:$0 sm:$0xff]  ;;  %v2232_v22 = vld [vmem:[%s2905_s3 + $0x58] sm:$0xff]   ;;  %vm1605_vm11 = vcmask 171008  }
  0x2a   :  { %1923 = vmatpush3.bf16.msra.mxu1 %v2222_v40 }
  0x2b   :  { %1924 = vmatprep.subr.bf16.mxu1 %v2318_v37 }
  0x2e   :  { %1925 = vmatpush3.bf16.msra.mxu1 %v2223_v41 }
  0x2f   :  { %1926 = vmatprep.subr.bf16.mxu1 %v2318_v37 }
  0x32   :  { %1927 = vmatpush3.bf16.msra.mxu1 %v2224_v42 }
  0x33   :  { %1928 = vmatprep.subr.bf16.mxu1 %v2318_v37 }
  0x36   :  { %1929 = vmatpush3.bf16.msra.mxu1 %v2225_v45 }
  0x37   :  { %1930 = vmatprep.subr.bf16.mxu1 %v2318_v37 }
  0x3a   :  { %1931 = vmatpush3.bf16.msra.mxu1 %v2226_v50 }
  0x3b   :  { %1936 = vmatprep.subr.bf16.mxu1 %v2318_v37 }
  0xf5   :  { %v166_v26 = vpop.f32.mrb[0].mxu0 }
  0xf6   :  { %v167_v27 = vadd.f32 %v166_v26, %v45_v24  ;;  %v168_v28 = vpop.f32.mrb[1].mxu0 }
  0xf7   :  { %v170_v29 = vpop.f32.mrb[2].mxu0  ;;  %v169_v30 = vadd.f32 %v168_v28, %v49_v25 }
  0xf8   :  { %v171_v31 = vpop.f32.mrb[3].mxu0  ;;  %v178_v32 = vrot.slane %v167_v27, 4  ;;  %v174_v33 = vrot.slane %v167_v27, 6  ;;  %v182_v39 = vrot.slane %v167_v27, 2 }
  0xf9   :  { %v191_v34 = vrot.slane %v169_v30, 4  ;;  %v187_v35 = vrot.slane %v169_v30, 6  ;;  %v195_v38 = vrot.slane %v169_v30, 2 }
  0xfa   :  { %179 = vrot.lane.b32.xlu1 %v178_v32, %s2316_s0  ;;  %175 = vrot.lane.b32.xlu0 %v174_v33, %s2317_s2 }
  0xfe   :  { %192 = vrot.lane.b32.xlu1 %v191_v34, %s2316_s0  ;;  %188 = vrot.lane.b32.xlu0 %v187_v35, %s2317_s2 }
 0x102   :  { %196 = vrot.lane.b32.xlu1 %v195_v38, %s2319_s8  ;;  %183 = vrot.lane.b32.xlu0 %v182_v39, %s2319_s8 }
 0x16c   :  { %v180_v43 = vpop.permute.xlu1 %179  ;;  %v176_v44 = vpop.permute.xlu0 %175 }
 0x16d   :  { %v200_v48 = vsel %vm199_vm0, %v167_v27, %v176_v44 }
 0x16e   :  { %v202_v53 = vsel %vm201_vm1, %v200_v48, %v180_v43 }
 0x170   :  { %v193_v46 = vpop.permute.xlu1 %192  ;;  %v189_v47 = vpop.permute.xlu0 %188 }
 0x171   :  { %v205_v49 = vsel %vm199_vm0, %v169_v30, %v189_v47 }
 0x172   :  { %v206_v52 = vsel %vm201_vm1, %v205_v49, %v193_v46 }
 0x174   :  { %v197_v51 = vpop.permute.xlu1 %196  ;;  %v184_v54 = vpop.permute.xlu0 %183 }
 0x175   :  { %v2443_v55 = vsel %vm203_vm2, %v206_v52, %v197_v51  ;;  %v2446_v56 = vsel %vm203_vm2, %v202_v53, %v184_v54  ;;  %v2233_v53 = vld [vmem:[%s2905_s3 + $0x60] sm:$0xff]   ;;  %v2234_v54 = vld [vmem:[%s2905_s3 + $0x68] sm:$0xff]  }
 0x176   :  { %v209_v57 = vmax.f32 %v2443_v55, 0.0  ;;  %v208_v58 = vmax.f32 %v2446_v56, 0.0  ;;  %1953 = vmatpush3.bf16.msra.mxu0 %v2233_v53 }
 0x177   :  { %1954 = vmatprep.subr.bf16.mxu0 %v2318_v37 }
 0x178   :  { %v226_v59 = vrot.slane %v209_v57, 6  ;;  %v225_v60 = vrot.slane %v208_v58, 6  ;;  %v231_v61 = vrot.slane %v208_v58, 2  ;;  %v2097_v62 = vpack.i.bf16 %v209_v57, %v208_v58  ;;  %v2236_v58 = vld [vmem:[%s2905_s3 + $0x78] sm:$0xff]  }
 0x179   :  { %v232_v63 = vrot.slane %v209_v57, 2  ;;  %v2235_v57 = vld [vmem:[%s2905_s3 + $0x70] sm:$0xff]  }
 0x17a   :  { %2098 = vrot.lane.b32.xlu0 %v2097_v62, %s2319_s8  ;;  %v227_v0 = vsel %vm199_vm0, %v225_v60, %v226_v59  ;;  %v230_v8 = vsel %vm199_vm0, 0.0, %v225_v60  ;;  %1955 = vmatpush3.bf16.msra.mxu0 %v2234_v54  ;;  %v352_v59 = vld [vmem:[%s2906_s4 + $0x2] ss:$0 sm:$0xff] }
 0x17b   :  { %v233_v1 = vsel %vm203_vm2, %v231_v61, %v232_v63  ;;  %v235_v2 = vsel %vm203_vm2, %v232_v63, 0.0  ;;  %1956 = vmatprep.subr.bf16.mxu0 %v2318_v37  ;;  %v2237_v60 = vld [vmem:[%s2905_s3 + $0x80] sm:$0xff]  }
 0x17c   :  { %v2102_v3 = vpack.i.bf16 %v235_v2, %v233_v1 }
 0x17e   :  { %2103 = vrot.lane.b32.xlu1 %v2102_v3, %s2316_s0  ;;  %1957 = vmatpush3.bf16.msra.mxu0 %v2235_v57 }
 0x17f   :  { %1958 = vmatprep.subr.bf16.mxu0 %v2318_v37 }
 0x182   :  { %1959 = vmatpush3.bf16.msra.mxu0 %v2236_v58 }
 0x183   :  { %1960 = vmatprep.subr.bf16.mxu0 %v2318_v37 }
 0x186   :  { %1961 = vmatpush3.bf16.msra.mxu0 %v2237_v60 }
 0x187   :  { %1962 = vmatprep.subr.bf16.mxu0 %v2318_v37 }
 0x1ec   :  { %v2099_v4 = vpop.permute.xlu0 %2098 }
 0x1ed   :  { %v2101_v5 = vunpack.i.h.bf16 %v2099_v4  ;;  %v2100_v6 = vunpack.i.l.bf16 %v2099_v4  ;;  %v2238_v4 = vld [vmem:[%s2905_s3 + $0x88] sm:$0xff]  }
 0x1ee   :  { %1963 = vmatpush3.bf16.msra.mxu0 %v2238_v4  ;;  %v2245_v4 = vld [vmem:[%s2905_s3 + $0xc0] sm:$0xff]  }
 0x1ef   :  { %v250_v11 = vsel %vm249_vm4, %v230_v8, %v2100_v6  ;;  %v251_v12 = vsel %vm249_vm4, %v227_v0, %v2101_v5  ;;  %1984 = vmatprep.subr.bf16.mxu0 %v2318_v37 }
 0x1f0   :  { %v2104_v7 = vpop.permute.xlu1 %2103 }
 0x1f1   :  { %v2106_v9 = vunpack.i.h.bf16 %v2104_v7  ;;  %v2105_v10 = vunpack.i.l.bf16 %v2104_v7 }
 0x1f3   :  { %v253_v13 = vsel %vm252_vm5, %v250_v11, %v2105_v10  ;;  %v254_v14 = vsel %vm252_vm5, %v251_v12, %v2106_v9 }
 0x1f4   :  { %v255_v15 = vpack.c.bf16 %v254_v14, %v253_v13 }
 0x1f6   :  { %1933 = vmatmul.mubr.msk.bf16.vlgmr.msra.gmra.mrb[0].mxu1 %vm292_vm6, %v255_v15 }
 0x1f7   :  { %1948 = vmatprep.mubr.msk.bf16.mxu1 %vm2320_vm3, %v2318_v37  ;;  %1937 = vmatpush3.bf16.msra.mxu1 %v2227_v16 }
 0x1f8   :  { %1938 = vmatprep.subr.bf16.mxu1 %v2318_v37 }
 0x1fb   :  { %1939 = vmatpush3.bf16.msra.mxu1 %v2228_v17 }
 0x1fc   :  { %1940 = vmatprep.subr.bf16.mxu1 %v2318_v37 }
 0x1ff   :  { %1941 = vmatpush3.bf16.msra.mxu1 %v2229_v18 }
 0x200   :  { %1942 = vmatprep.subr.bf16.mxu1 %v2318_v37 }
 0x203   :  { %1943 = vmatpush3.bf16.msra.mxu1 %v2230_v19 }
 0x204   :  { %1944 = vmatprep.subr.bf16.mxu1 %v2318_v37 }
 0x207   :  { %1945 = vmatpush3.bf16.msra.mxu1 %v2231_v20 }
 0x208   :  { %1946 = vmatprep.subr.bf16.mxu1 %v2318_v37 }
 0x20b   :  { %1947 = vmatpush3.bf16.msra.mxu1 %v2232_v22 }
 0x20c   :  { %1968 = vmatprep.subr.bf16.mxu1 %v2318_v37 }
 0x2c9   :  { %v330_v23 = vpop.f32.mrb[0].mxu1 }
 0x2ca   :  { %v331_v24 = vadd.f32 %v330_v23, %v222_v21  ;;  %v1934_v25 = vpop.f32.mrb[1].mxu1 }
 0x2cb   :  { %v333_v26 = vpop.f32.mrb[2].mxu1 }
 0x2cc   :  { %v337_v27 = vmax.f32 %v331_v24, 0.0  ;;  %v334_v28 = vadd.f32 %v333_v26, %v222_v21  ;;  %v1935_v29 = vpop.f32.mrb[3].mxu1 }
 0x2cd   :  { %v2239_v29 = vld [vmem:[%s2905_s3 + $0x90] sm:$0xff]  }
 0x2ce   :  { %v338_v30 = vmax.f32 %v334_v28, 0.0  ;;  %v355_v31 = vrot.slane %v337_v27, 6  ;;  %v361_v32 = vrot.slane %v337_v27, 2 }
 0x2d0   :  { %v356_v33 = vrot.slane %v338_v30, 6  ;;  %v362_v34 = vrot.slane %v338_v30, 2  ;;  %v2107_v35 = vpack.i.bf16 %v338_v30, %v337_v27  ;;  %v360_v45 = vsel %vm199_vm0, 0.0, %v355_v31  ;;  %v2240_v30 = vld [vmem:[%s2905_s3 + $0x98] sm:$0xff]  }
 0x2d2   :  { %2108 = vrot.lane.b32.xlu0 %v2107_v35, %s2319_s8  ;;  %v363_v36 = vsel %vm203_vm2, %v361_v32, %v362_v34  ;;  %v365_v38 = vsel %vm203_vm2, %v362_v34, 0.0  ;;  %v357_v39 = vsel %vm199_vm0, %v355_v31, %v356_v33  ;;  %v2241_v31 = vld [vmem:[%s2905_s3 + $0xa0] sm:$0xff]   ;;  %v2242_v32 = vld [vmem:[%s2905_s3 + $0xa8] sm:$0xff]   ;;  %v2243_v33 = vld [vmem:[%s2905_s3 + $0xb0] sm:$0xff]  }
 0x2d3   :  { %v2112_v40 = vpack.i.bf16 %v365_v38, %v363_v36  ;;  %v483_v34 = vld [vmem:[%s2906_s4 + $0x3] ss:$0 sm:$0xff]  ;;  %v2244_v35 = vld [vmem:[%s2905_s3 + $0xb8] sm:$0xff]  }
 0x2d5   :  { %2113 = vrot.lane.b32.xlu1 %v2112_v40, %s2316_s0 }
 0x344   :  { %v2109_v41 = vpop.permute.xlu0 %2108 }
 0x345   :  { %v2111_v42 = vunpack.i.h.bf16 %v2109_v41  ;;  %v2110_v43 = vunpack.i.l.bf16 %v2109_v41 }
 0x347   :  { %v2114_v44 = vpop.permute.xlu1 %2113  ;;  %v379_v48 = vsel %vm249_vm4, %v360_v45, %v2110_v43  ;;  %v380_v49 = vsel %vm249_vm4, %v357_v39, %v2111_v42 }
 0x348   :  { %v2116_v46 = vunpack.i.h.bf16 %v2114_v44  ;;  %v2115_v47 = vunpack.i.l.bf16 %v2114_v44 }
 0x34a   :  { %v381_v50 = vsel %vm252_vm5, %v379_v48, %v2115_v47  ;;  %v382_v51 = vsel %vm252_vm5, %v380_v49, %v2116_v46 }
 0x34b   :  { %v383_v52 = vpack.c.bf16 %v382_v51, %v381_v50 }
 0x34d   :  { %1949 = vmatmul.mubr.msk.bf16.vlgmr.msra.gmra.mrb[4].mxu1 %vm292_vm6, %v383_v52 }
 0x34e   :  { %1980 = vmatprep.mubr.msk.bf16.mxu1 %vm2320_vm3, %v2318_v37  ;;  %1969 = vmatpush3.bf16.msra.mxu1 %v2239_v29 }
 0x34f   :  { %1970 = vmatprep.subr.bf16.mxu1 %v2318_v37 }
 0x352   :  { %1971 = vmatpush3.bf16.msra.mxu1 %v2240_v30 }
 0x353   :  { %1972 = vmatprep.subr.bf16.mxu1 %v2318_v37 }
 0x356   :  { %1973 = vmatpush3.bf16.msra.mxu1 %v2241_v31 }
 0x357   :  { %1974 = vmatprep.subr.bf16.mxu1 %v2318_v37 }
 0x35a   :  { %1975 = vmatpush3.bf16.msra.mxu1 %v2242_v32 }
 0x35b   :  { %1976 = vmatprep.subr.bf16.mxu1 %v2318_v37 }
 0x35e   :  { %1977 = vmatpush3.bf16.msra.mxu1 %v2243_v33 }
 0x35f   :  { %1978 = vmatprep.subr.bf16.mxu1 %v2318_v37 }
 0x362   :  { %1979 = vmatpush3.bf16.msra.mxu1 %v2244_v35 }
 0x363   :  { %2000 = vmatprep.subr.bf16.mxu1 %v2318_v37 }
 0x420   :  { %v457_v61 = vpop.f32.mrb[4].mxu1 }
 0x421   :  { %v458_v62 = vadd.f32 %v457_v61, %v352_v59  ;;  %v1950_v63 = vpop.f32.mrb[5].mxu1 }
 0x422   :  { %v460_v0 = vpop.f32.mrb[6].mxu1 }
 0x423   :  { %v464_v1 = vmul.f32 0.3, %v458_v62  ;;  %v461_v2 = vadd.f32 %v460_v0, %v352_v59  ;;  %v1951_v3 = vpop.f32.mrb[7].mxu1 }
 0x425   :  { %v2534_v5 = vadd.f32 %v464_v1, %v2446_v56  ;;  %v465_v6 = vmul.f32 0.3, %v461_v2 }
 0x427   :  { %v468_v7 = vmax.f32 %v2534_v5, 0.0  ;;  %v2539_v8 = vadd.f32 %v465_v6, %v2443_v55  ;;  %v2246_v6 = vld [vmem:[%s2905_s3 + $0xc8] sm:$0xff]  }
 0x429   :  { %v469_v9 = vmax.f32 %v2539_v8, 0.0  ;;  %v486_v10 = vrot.slane %v468_v7, 6  ;;  %v492_v13 = vrot.slane %v468_v7, 2 }
 0x42b   :  { %v487_v11 = vrot.slane %v469_v9, 6  ;;  %v2117_v12 = vpack.i.bf16 %v469_v9, %v468_v7  ;;  %v493_v14 = vrot.slane %v469_v9, 2  ;;  %v491_v21 = vsel %vm199_vm0, 0.0, %v486_v10  ;;  %v2247_v7 = vld [vmem:[%s2905_s3 + $0xd0] sm:$0xff]   ;;  %v2248_v9 = vld [vmem:[%s2905_s3 + $0xd8] sm:$0xff]  }
 0x42d   :  { %2118 = vrot.lane.b32.xlu0 %v2117_v12, %s2319_s8  ;;  %v494_v56 = vsel %vm203_vm2, %v492_v13, %v493_v14  ;;  %v496_v15 = vsel %vm203_vm2, %v493_v14, 0.0  ;;  %v488_v16 = vsel %vm199_vm0, %v486_v10, %v487_v11  ;;  %v610_v10 = vld [vmem:[%s2906_s4 + $0x4] ss:$0 sm:$0xff] }
 0x42e   :  { %v2122_v17 = vpack.i.bf16 %v496_v15, %v494_v56  ;;  %v2249_v11 = vld [vmem:[%s2905_s3 + $0xe0] sm:$0xff]  }
 0x430   :  { %2123 = vrot.lane.b32.xlu1 %v2122_v17, %s2316_s0 }
 0x49f   :  { %v2119_v55 = vpop.permute.xlu0 %2118 }
 0x4a0   :  { %v2121_v18 = vunpack.i.h.bf16 %v2119_v55  ;;  %v2120_v19 = vunpack.i.l.bf16 %v2119_v55  ;;  %v2250_v55 = vld [vmem:[%s2905_s3 + $0xe8] sm:$0xff]  }
 0x4a2   :  { %v2124_v20 = vpop.permute.xlu1 %2123  ;;  %v510_v24 = vsel %vm249_vm4, %v491_v21, %v2120_v19  ;;  %v511_v25 = vsel %vm249_vm4, %v488_v16, %v2121_v18 }
 0x4a3   :  { %v2126_v22 = vunpack.i.h.bf16 %v2124_v20  ;;  %v2125_v23 = vunpack.i.l.bf16 %v2124_v20 }
 0x4a5   :  { %v512_v26 = vsel %vm252_vm5, %v510_v24, %v2125_v23  ;;  %v513_v27 = vsel %vm252_vm5, %v511_v25, %v2126_v22 }
 0x4a6   :  { %v514_v28 = vpack.c.bf16 %v513_v27, %v512_v26 }
 0x4a8   :  { %1965 = vmatmul.mubr.msk.bf16.vlgmr.msra.gmra.mrb[4].mxu0 %vm292_vm6, %v514_v28 }
 0x4a9   :  { %1996 = vmatprep.mubr.msk.bf16.mxu0 %vm2320_vm3, %v2318_v37  ;;  %1985 = vmatpush3.bf16.msra.mxu0 %v2245_v4 }
 0x4aa   :  { %1986 = vmatprep.subr.bf16.mxu0 %v2318_v37 }
 0x4ad   :  { %1987 = vmatpush3.bf16.msra.mxu0 %v2246_v6 }
 0x4ae   :  { %1988 = vmatprep.subr.bf16.mxu0 %v2318_v37 }
 0x4b1   :  { %1989 = vmatpush3.bf16.msra.mxu0 %v2247_v7 }
 0x4b2   :  { %1990 = vmatprep.subr.bf16.mxu0 %v2318_v37 }
 0x4b5   :  { %1991 = vmatpush3.bf16.msra.mxu0 %v2248_v9 }
 0x4b6   :  { %1992 = vmatprep.subr.bf16.mxu0 %v2318_v37 }
 0x4b9   :  { %1993 = vmatpush3.bf16.msra.mxu0 %v2249_v11 }
 0x4ba   :  { %1994 = vmatprep.subr.bf16.mxu0 %v2318_v37 }
 0x4bd   :  { %1995 = vmatpush3.bf16.msra.mxu0 %v2250_v55  ;;  %v2257_v55 = vld [vmem:[%s2905_s3 + $0x120] sm:$0xff]  }
 0x4be   :  { %2016 = vmatprep.subr.bf16.mxu0 %v2318_v37 }
 0x57b   :  { %v588_v36 = vpop.f32.mrb[4].mxu0 }
 0x57c   :  { %v589_v38 = vadd.f32 %v588_v36, %v483_v34  ;;  %v1966_v39 = vpop.f32.mrb[5].mxu0 }
 0x57d   :  { %v591_v40 = vpop.f32.mrb[6].mxu0 }
 0x57e   :  { %v595_v41 = vmax.f32 %v589_v38, 0.0  ;;  %v592_v42 = vadd.f32 %v591_v40, %v483_v34  ;;  %v1967_v43 = vpop.f32.mrb[7].mxu0 }
 0x57f   :  { %v2251_v43 = vld [vmem:[%s2905_s3 + $0xf0] sm:$0xff]  }
 0x580   :  { %v596_v44 = vmax.f32 %v592_v42, 0.0  ;;  %v613_v45 = vrot.slane %v595_v41, 6  ;;  %v619_v46 = vrot.slane %v595_v41, 2 }
 0x582   :  { %v614_v47 = vrot.slane %v596_v44, 6  ;;  %v620_v48 = vrot.slane %v596_v44, 2  ;;  %v2127_v49 = vpack.i.bf16 %v596_v44, %v595_v41  ;;  %v618_v60 = vsel %vm199_vm0, 0.0, %v613_v45  ;;  %v2252_v44 = vld [vmem:[%s2905_s3 + $0xf8] sm:$0xff]  }
 0x584   :  { %2128 = vrot.lane.b32.xlu0 %v2127_v49, %s2319_s8  ;;  %v621_v50 = vsel %vm203_vm2, %v619_v46, %v620_v48  ;;  %v623_v51 = vsel %vm203_vm2, %v620_v48, 0.0  ;;  %v615_v52 = vsel %vm199_vm0, %v613_v45, %v614_v47  ;;  %v2253_v45 = vld [vmem:[%s2905_s3 + $0x100] sm:$0xff]   ;;  %v2254_v46 = vld [vmem:[%s2905_s3 + $0x108] sm:$0xff]   ;;  %v2255_v47 = vld [vmem:[%s2905_s3 + $0x110] sm:$0xff]  }
 0x585   :  { %v2132_v53 = vpack.i.bf16 %v623_v51, %v621_v50  ;;  %v741_v48 = vld [vmem:[%s2906_s4 + $0x5] ss:$0 sm:$0xff]  ;;  %v2256_v49 = vld [vmem:[%s2905_s3 + $0x118] sm:$0xff]  }
 0x587   :  { %2133 = vrot.lane.b32.xlu1 %v2132_v53, %s2316_s0 }
 0x5f6   :  { %v2129_v54 = vpop.permute.xlu0 %2128 }
 0x5f7   :  { %v2131_v57 = vunpack.i.h.bf16 %v2129_v54  ;;  %v2130_v58 = vunpack.i.l.bf16 %v2129_v54 }
 0x5f9   :  { %v2134_v59 = vpop.permute.xlu1 %2133  ;;  %v637_v63 = vsel %vm249_vm4, %v618_v60, %v2130_v58  ;;  %v638_v0 = vsel %vm249_vm4, %v615_v52, %v2131_v57 }
 0x5fa   :  { %v2136_v61 = vunpack.i.h.bf16 %v2134_v59  ;;  %v2135_v62 = vunpack.i.l.bf16 %v2134_v59 }
 0x5fc   :  { %v639_v1 = vsel %vm252_vm5, %v637_v63, %v2135_v62  ;;  %v640_v2 = vsel %vm252_vm5, %v638_v0, %v2136_v61 }
 0x5fd   :  { %v641_v3 = vpack.c.bf16 %v640_v2, %v639_v1 }
 0x5ff   :  { %1981 = vmatmul.mubr.msk.bf16.vlgmr.msra.gmra.mrb[8].mxu1 %vm292_vm6, %v641_v3 }
 0x600   :  { %2012 = vmatprep.mubr.msk.bf16.mxu1 %vm2320_vm3, %v2318_v37  ;;  %2001 = vmatpush3.bf16.msra.mxu1 %v2251_v43 }
 0x601   :  { %2002 = vmatprep.subr.bf16.mxu1 %v2318_v37 }
 0x604   :  { %2003 = vmatpush3.bf16.msra.mxu1 %v2252_v44 }
 0x605   :  { %2004 = vmatprep.subr.bf16.mxu1 %v2318_v37 }
 0x608   :  { %2005 = vmatpush3.bf16.msra.mxu1 %v2253_v45 }
 0x609   :  { %2006 = vmatprep.subr.bf16.mxu1 %v2318_v37 }
 0x60c   :  { %2007 = vmatpush3.bf16.msra.mxu1 %v2254_v46 }
 0x60d   :  { %2008 = vmatprep.subr.bf16.mxu1 %v2318_v37 }
 0x610   :  { %2009 = vmatpush3.bf16.msra.mxu1 %v2255_v47 }
 0x611   :  { %2010 = vmatprep.subr.bf16.mxu1 %v2318_v37 }
 0x614   :  { %2011 = vmatpush3.bf16.msra.mxu1 %v2256_v49 }
 0x615   :  { %2032 = vmatprep.subr.bf16.mxu1 %v2318_v37 }
 0x6d2   :  { %v715_v12 = vpop.f32.mrb[8].mxu1 }
 0x6d3   :  { %v716_v13 = vadd.f32 %v715_v12, %v610_v10  ;;  %v1982_v14 = vpop.f32.mrb[9].mxu1 }
 0x6d4   :  { %v718_v56 = vpop.f32.mrb[10].mxu1 }
 0x6d5   :  { %v722_v15 = vmul.f32 0.3, %v716_v13  ;;  %v719_v16 = vadd.f32 %v718_v56, %v610_v10  ;;  %v1983_v17 = vpop.f32.mrb[11].mxu1 }
 0x6d7   :  { %v2622_v18 = vadd.f32 %v722_v15, %v2534_v5  ;;  %v723_v19 = vmul.f32 0.3, %v719_v16 }
 0x6d9   :  { %v726_v20 = vmax.f32 %v2622_v18, 0.0  ;;  %v2627_v21 = vadd.f32 %v723_v19, %v2539_v8  ;;  %v2258_v19 = vld [vmem:[%s2905_s3 + $0x128] sm:$0xff]  }
 0x6db   :  { %v727_v22 = vmax.f32 %v2627_v21, 0.0  ;;  %v744_v23 = vrot.slane %v726_v20, 6  ;;  %v750_v26 = vrot.slane %v726_v20, 2 }
 0x6dd   :  { %v745_v24 = vrot.slane %v727_v22, 6  ;;  %v2137_v25 = vpack.i.bf16 %v727_v22, %v726_v20  ;;  %v751_v27 = vrot.slane %v727_v22, 2  ;;  %v749_v34 = vsel %vm199_vm0, 0.0, %v744_v23  ;;  %v2259_v20 = vld [vmem:[%s2905_s3 + $0x130] sm:$0xff]   ;;  %v2260_v22 = vld [vmem:[%s2905_s3 + $0x138] sm:$0xff]  }
 0x6df   :  { %2138 = vrot.lane.b32.xlu0 %v2137_v25, %s2319_s8  ;;  %v752_v5 = vsel %vm203_vm2, %v750_v26, %v751_v27  ;;  %v754_v28 = vsel %vm203_vm2, %v751_v27, 0.0  ;;  %v746_v29 = vsel %vm199_vm0, %v744_v23, %v745_v24  ;;  %v868_v23 = vld [vmem:[%s2906_s4 + $0x6] ss:$0 sm:$0xff] }
 0x6e0   :  { %v2142_v30 = vpack.i.bf16 %v754_v28, %v752_v5  ;;  %v2261_v24 = vld [vmem:[%s2905_s3 + $0x140] sm:$0xff]  }
 0x6e2   :  { %2143 = vrot.lane.b32.xlu1 %v2142_v30, %s2316_s0 }
 0x751   :  { %v2139_v8 = vpop.permute.xlu0 %2138 }
 0x752   :  { %v2141_v31 = vunpack.i.h.bf16 %v2139_v8  ;;  %v2140_v32 = vunpack.i.l.bf16 %v2139_v8  ;;  %v2262_v8 = vld [vmem:[%s2905_s3 + $0x148] sm:$0xff]  }
 0x754   :  { %v2144_v33 = vpop.permute.xlu1 %2143  ;;  %v768_v38 = vsel %vm249_vm4, %v749_v34, %v2140_v32  ;;  %v769_v39 = vsel %vm249_vm4, %v746_v29, %v2141_v31 }
 0x755   :  { %v2146_v35 = vunpack.i.h.bf16 %v2144_v33  ;;  %v2145_v36 = vunpack.i.l.bf16 %v2144_v33 }
 0x757   :  { %v770_v40 = vsel %vm252_vm5, %v768_v38, %v2145_v36  ;;  %v771_v41 = vsel %vm252_vm5, %v769_v39, %v2146_v35 }
 0x758   :  { %v772_v42 = vpack.c.bf16 %v771_v41, %v770_v40 }
 0x75a   :  { %1997 = vmatmul.mubr.msk.bf16.vlgmr.msra.gmra.mrb[8].mxu0 %vm292_vm6, %v772_v42 }
 0x75b   :  { %2028 = vmatprep.mubr.msk.bf16.mxu0 %vm2320_vm3, %v2318_v37  ;;  %2017 = vmatpush3.bf16.msra.mxu0 %v2257_v55 }
 0x75c   :  { %2018 = vmatprep.subr.bf16.mxu0 %v2318_v37 }
 0x75f   :  { %2019 = vmatpush3.bf16.msra.mxu0 %v2258_v19 }
 0x760   :  { %2020 = vmatprep.subr.bf16.mxu0 %v2318_v37 }
 0x763   :  { %2021 = vmatpush3.bf16.msra.mxu0 %v2259_v20 }
 0x764   :  { %2022 = vmatprep.subr.bf16.mxu0 %v2318_v37 }
 0x767   :  { %2023 = vmatpush3.bf16.msra.mxu0 %v2260_v22 }
 0x768   :  { %2024 = vmatprep.subr.bf16.mxu0 %v2318_v37 }
 0x76b   :  { %2025 = vmatpush3.bf16.msra.mxu0 %v2261_v24 }
 0x76c   :  { %2026 = vmatprep.subr.bf16.mxu0 %v2318_v37 }
 0x76f   :  { %2027 = vmatpush3.bf16.msra.mxu0 %v2262_v8  ;;  %v2269_v8 = vld [vmem:[%s2905_s3 + $0x180] sm:$0xff]  }
 0x770   :  { %2048 = vmatprep.subr.bf16.mxu0 %v2318_v37 }
 0x82d   :  { %v846_v50 = vpop.f32.mrb[8].mxu0 }
 0x82e   :  { %v847_v51 = vadd.f32 %v846_v50, %v741_v48  ;;  %v1998_v52 = vpop.f32.mrb[9].mxu0 }
 0x82f   :  { %v849_v53 = vpop.f32.mrb[10].mxu0 }
 0x830   :  { %v853_v54 = vmax.f32 %v847_v51, 0.0  ;;  %v850_v57 = vadd.f32 %v849_v53, %v741_v48  ;;  %v1999_v58 = vpop.f32.mrb[11].mxu0 }
 0x831   :  { %v2263_v58 = vld [vmem:[%s2905_s3 + $0x150] sm:$0xff]  }
 0x832   :  { %v854_v59 = vmax.f32 %v850_v57, 0.0  ;;  %v871_v60 = vrot.slane %v853_v54, 6  ;;  %v877_v61 = vrot.slane %v853_v54, 2 }
 0x834   :  { %v872_v62 = vrot.slane %v854_v59, 6  ;;  %v878_v63 = vrot.slane %v854_v59, 2  ;;  %v2147_v0 = vpack.i.bf16 %v854_v59, %v853_v54  ;;  %v876_v11 = vsel %vm199_vm0, 0.0, %v871_v60  ;;  %v2264_v59 = vld [vmem:[%s2905_s3 + $0x158] sm:$0xff]  }
 0x836   :  { %2148 = vrot.lane.b32.xlu0 %v2147_v0, %s2319_s8  ;;  %v879_v1 = vsel %vm203_vm2, %v877_v61, %v878_v63  ;;  %v881_v2 = vsel %vm203_vm2, %v878_v63, 0.0  ;;  %v873_v3 = vsel %vm199_vm0, %v871_v60, %v872_v62  ;;  %v2265_v60 = vld [vmem:[%s2905_s3 + $0x160] sm:$0xff]   ;;  %v2266_v61 = vld [vmem:[%s2905_s3 + $0x168] sm:$0xff]   ;;  %v2267_v62 = vld [vmem:[%s2905_s3 + $0x170] sm:$0xff]  }
 0x837   :  { %v2152_v4 = vpack.i.bf16 %v881_v2, %v879_v1  ;;  %v999_v63 = vld [vmem:[%s2906_s4 + $0x7] ss:$0 sm:$0xff]  ;;  %v2268_v0 = vld [vmem:[%s2905_s3 + $0x178] sm:$0xff]  }
 0x839   :  { %2153 = vrot.lane.b32.xlu1 %v2152_v4, %s2316_s0 }
 0x8a8   :  { %v2149_v6 = vpop.permute.xlu0 %2148 }
 0x8a9   :  { %v2151_v7 = vunpack.i.h.bf16 %v2149_v6  ;;  %v2150_v9 = vunpack.i.l.bf16 %v2149_v6 }
 0x8ab   :  { %v2154_v10 = vpop.permute.xlu1 %2153  ;;  %v895_v14 = vsel %vm249_vm4, %v876_v11, %v2150_v9  ;;  %v896_v56 = vsel %vm249_vm4, %v873_v3, %v2151_v7 }
 0x8ac   :  { %v2156_v12 = vunpack.i.h.bf16 %v2154_v10  ;;  %v2155_v13 = vunpack.i.l.bf16 %v2154_v10 }
 0x8ae   :  { %v897_v15 = vsel %vm252_vm5, %v895_v14, %v2155_v13  ;;  %v898_v16 = vsel %vm252_vm5, %v896_v56, %v2156_v12 }
 0x8af   :  { %v899_v17 = vpack.c.bf16 %v898_v16, %v897_v15 }
 0x8b1   :  { %2013 = vmatmul.mubr.msk.bf16.vlgmr.msra.gmra.mrb[12].mxu1 %vm292_vm6, %v899_v17 }
 0x8b2   :  { %2044 = vmatprep.mubr.msk.bf16.mxu1 %vm2320_vm3, %v2318_v37  ;;  %2033 = vmatpush3.bf16.msra.mxu1 %v2263_v58 }
 0x8b3   :  { %2034 = vmatprep.subr.bf16.mxu1 %v2318_v37 }
 0x8b6   :  { %2035 = vmatpush3.bf16.msra.mxu1 %v2264_v59 }
 0x8b7   :  { %2036 = vmatprep.subr.bf16.mxu1 %v2318_v37 }
 0x8ba   :  { %2037 = vmatpush3.bf16.msra.mxu1 %v2265_v60 }
 0x8bb   :  { %2038 = vmatprep.subr.bf16.mxu1 %v2318_v37 }
 0x8be   :  { %2039 = vmatpush3.bf16.msra.mxu1 %v2266_v61 }
 0x8bf   :  { %2040 = vmatprep.subr.bf16.mxu1 %v2318_v37 }
 0x8c2   :  { %2041 = vmatpush3.bf16.msra.mxu1 %v2267_v62 }
 0x8c3   :  { %2042 = vmatprep.subr.bf16.mxu1 %v2318_v37 }
 0x8c6   :  { %2043 = vmatpush3.bf16.msra.mxu1 %v2268_v0 }
 0x8c7   :  { %2064 = vmatprep.subr.bf16.mxu1 %v2318_v37 }
 0x984   :  { %v973_v25 = vpop.f32.mrb[12].mxu1 }
 0x985   :  { %v974_v26 = vadd.f32 %v973_v25, %v868_v23  ;;  %v2014_v27 = vpop.f32.mrb[13].mxu1 }
 0x986   :  { %v976_v5 = vpop.f32.mrb[14].mxu1 }
 0x987   :  { %v980_v28 = vmul.f32 0.3, %v974_v26  ;;  %v977_v29 = vadd.f32 %v976_v5, %v868_v23  ;;  %v2015_v30 = vpop.f32.mrb[15].mxu1 }
 0x989   :  { %v2710_v31 = vadd.f32 %v980_v28, %v2622_v18  ;;  %v981_v32 = vmul.f32 0.3, %v977_v29 }
 0x98b   :  { %v984_v33 = vmax.f32 %v2710_v31, 0.0  ;;  %v2715_v34 = vadd.f32 %v981_v32, %v2627_v21  ;;  %v2270_v32 = vld [vmem:[%s2905_s3 + $0x188] sm:$0xff]  }
 0x98d   :  { %v985_v35 = vmax.f32 %v2715_v34, 0.0  ;;  %v1002_v36 = vrot.slane %v984_v33, 6  ;;  %v1008_v40 = vrot.slane %v984_v33, 2 }
 0x98f   :  { %v1003_v38 = vrot.slane %v985_v35, 6  ;;  %v2157_v39 = vpack.i.bf16 %v985_v35, %v984_v33  ;;  %v1009_v41 = vrot.slane %v985_v35, 2  ;;  %v1007_v48 = vsel %vm199_vm0, 0.0, %v1002_v36  ;;  %v2271_v33 = vld [vmem:[%s2905_s3 + $0x190] sm:$0xff]   ;;  %v2272_v35 = vld [vmem:[%s2905_s3 + $0x198] sm:$0xff]  }
 0x991   :  { %2158 = vrot.lane.b32.xlu0 %v2157_v39, %s2319_s8  ;;  %v1010_v18 = vsel %vm203_vm2, %v1008_v40, %v1009_v41  ;;  %v1012_v42 = vsel %vm203_vm2, %v1009_v41, 0.0  ;;  %v1004_v43 = vsel %vm199_vm0, %v1002_v36, %v1003_v38  ;;  %v1126_v36 = vld [vmem:[%s2906_s4 + $0x10] ss:$0 sm:$0xff]  ;;  %v2273_v38 = vld [vmem:[%s2905_s3 + $0x1a0] sm:$0xff]  }
 0x992   :  { %v2162_v44 = vpack.i.bf16 %v1012_v42, %v1010_v18 }
 0x994   :  { %2163 = vrot.lane.b32.xlu1 %v2162_v44, %s2316_s0 }
 0xa03   :  { %v2159_v21 = vpop.permute.xlu0 %2158 }
 0xa04   :  { %v2161_v45 = vunpack.i.h.bf16 %v2159_v21  ;;  %v2160_v46 = vunpack.i.l.bf16 %v2159_v21  ;;  %v2274_v21 = vld [vmem:[%s2905_s3 + $0x1a8] sm:$0xff]  }
 0xa06   :  { %v2164_v47 = vpop.permute.xlu1 %2163  ;;  %v1026_v51 = vsel %vm249_vm4, %v1007_v48, %v2160_v46  ;;  %v1027_v52 = vsel %vm249_vm4, %v1004_v43, %v2161_v45 }
 0xa07   :  { %v2166_v49 = vunpack.i.h.bf16 %v2164_v47  ;;  %v2165_v50 = vunpack.i.l.bf16 %v2164_v47 }
 0xa09   :  { %v1028_v53 = vsel %vm252_vm5, %v1026_v51, %v2165_v50  ;;  %v1029_v54 = vsel %vm252_vm5, %v1027_v52, %v2166_v49 }
 0xa0a   :  { %v1030_v57 = vpack.c.bf16 %v1029_v54, %v1028_v53 }
 0xa0c   :  { %2029 = vmatmul.mubr.msk.bf16.vlgmr.msra.gmra.mrb[12].mxu0 %vm292_vm6, %v1030_v57 }
 0xa0d   :  { %2060 = vmatprep.mubr.msk.bf16.mxu0 %vm2320_vm3, %v2318_v37  ;;  %2049 = vmatpush3.bf16.msra.mxu0 %v2269_v8 }
 0xa0e   :  { %2050 = vmatprep.subr.bf16.mxu0 %v2318_v37 }
 0xa11   :  { %2051 = vmatpush3.bf16.msra.mxu0 %v2270_v32 }
 0xa12   :  { %2052 = vmatprep.subr.bf16.mxu0 %v2318_v37 }
 0xa15   :  { %2053 = vmatpush3.bf16.msra.mxu0 %v2271_v33 }
 0xa16   :  { %2054 = vmatprep.subr.bf16.mxu0 %v2318_v37 }
 0xa19   :  { %2055 = vmatpush3.bf16.msra.mxu0 %v2272_v35 }
 0xa1a   :  { %2056 = vmatprep.subr.bf16.mxu0 %v2318_v37 }
 0xa1d   :  { %2057 = vmatpush3.bf16.msra.mxu0 %v2273_v38 }
 0xa1e   :  { %2058 = vmatprep.subr.bf16.mxu0 %v2318_v37 }
 0xa21   :  { %2059 = vmatpush3.bf16.msra.mxu0 %v2274_v21  ;;  %v2281_v21 = vld [vmem:[%s2905_s3 + $0x1e0] sm:$0xff]  }
 0xa22   :  { %2080 = vmatprep.subr.bf16.mxu0 %v2318_v37 }
 0xadf   :  { %v1104_v1 = vpop.f32.mrb[12].mxu0 }
 0xae0   :  { %v1105_v2 = vadd.f32 %v1104_v1, %v999_v63  ;;  %v2030_v3 = vpop.f32.mrb[13].mxu0 }
 0xae1   :  { %v1107_v4 = vpop.f32.mrb[14].mxu0 }
 0xae2   :  { %v1111_v6 = vmax.f32 %v1105_v2, 0.0  ;;  %v1108_v7 = vadd.f32 %v1107_v4, %v999_v63  ;;  %v2031_v9 = vpop.f32.mrb[15].mxu0 }
 0xae3   :  { %v2275_v9 = vld [vmem:[%s2905_s3 + $0x1b0] sm:$0xff]  }
 0xae4   :  { %v1112_v10 = vmax.f32 %v1108_v7, 0.0  ;;  %v1129_v11 = vrot.slane %v1111_v6, 6  ;;  %v1135_v12 = vrot.slane %v1111_v6, 2 }
 0xae6   :  { %v1130_v13 = vrot.slane %v1112_v10, 6  ;;  %v1136_v14 = vrot.slane %v1112_v10, 2  ;;  %v2167_v56 = vpack.i.bf16 %v1112_v10, %v1111_v6  ;;  %v1134_v24 = vsel %vm199_vm0, 0.0, %v1129_v11  ;;  %v2276_v10 = vld [vmem:[%s2905_s3 + $0x1b8] sm:$0xff]  }
 0xae8   :  { %2168 = vrot.lane.b32.xlu0 %v2167_v56, %s2319_s8  ;;  %v1137_v15 = vsel %vm203_vm2, %v1135_v12, %v1136_v14  ;;  %v1139_v16 = vsel %vm203_vm2, %v1136_v14, 0.0  ;;  %v1131_v17 = vsel %vm199_vm0, %v1129_v11, %v1130_v13  ;;  %v2277_v11 = vld [vmem:[%s2905_s3 + $0x1c0] sm:$0xff]   ;;  %v2278_v12 = vld [vmem:[%s2905_s3 + $0x1c8] sm:$0xff]   ;;  %v2279_v13 = vld [vmem:[%s2905_s3 + $0x1d0] sm:$0xff]  }
 0xae9   :  { %v2172_v55 = vpack.i.bf16 %v1139_v16, %v1137_v15  ;;  %v1257_v14 = vld [vmem:[%s2906_s4 + $0x11] ss:$0 sm:$0xff]  ;;  %v2280_v56 = vld [vmem:[%s2905_s3 + $0x1d8] sm:$0xff]  }
 0xaeb   :  { %2173 = vrot.lane.b32.xlu1 %v2172_v55, %s2316_s0 }
 0xb5a   :  { %v2169_v19 = vpop.permute.xlu0 %2168 }
 0xb5b   :  { %v2171_v20 = vunpack.i.h.bf16 %v2169_v19  ;;  %v2170_v22 = vunpack.i.l.bf16 %v2169_v19 }
 0xb5d   :  { %v2174_v23 = vpop.permute.xlu1 %2173  ;;  %v1153_v27 = vsel %vm249_vm4, %v1134_v24, %v2170_v22  ;;  %v1154_v5 = vsel %vm249_vm4, %v1131_v17, %v2171_v20 }
 0xb5e   :  { %v2176_v25 = vunpack.i.h.bf16 %v2174_v23  ;;  %v2175_v26 = vunpack.i.l.bf16 %v2174_v23 }
 0xb60   :  { %v1155_v28 = vsel %vm252_vm5, %v1153_v27, %v2175_v26  ;;  %v1156_v29 = vsel %vm252_vm5, %v1154_v5, %v2176_v25 }
 0xb61   :  { %v1157_v30 = vpack.c.bf16 %v1156_v29, %v1155_v28 }
 0xb63   :  { %2045 = vmatmul.mubr.msk.bf16.vlgmr.msra.gmra.mrb[16].mxu1 %vm292_vm6, %v1157_v30 }
 0xb64   :  { %2076 = vmatprep.mubr.msk.bf16.mxu1 %vm2320_vm3, %v2318_v37  ;;  %2065 = vmatpush3.bf16.msra.mxu1 %v2275_v9 }
 0xb65   :  { %2066 = vmatprep.subr.bf16.mxu1 %v2318_v37 }
 0xb68   :  { %2067 = vmatpush3.bf16.msra.mxu1 %v2276_v10 }
 0xb69   :  { %2068 = vmatprep.subr.bf16.mxu1 %v2318_v37 }
 0xb6c   :  { %2069 = vmatpush3.bf16.msra.mxu1 %v2277_v11 }
 0xb6d   :  { %2070 = vmatprep.subr.bf16.mxu1 %v2318_v37 }
 0xb70   :  { %2071 = vmatpush3.bf16.msra.mxu1 %v2278_v12 }
 0xb71   :  { %2072 = vmatprep.subr.bf16.mxu1 %v2318_v37 }
 0xb74   :  { %2073 = vmatpush3.bf16.msra.mxu1 %v2279_v13 }
 0xb75   :  { %2074 = vmatprep.subr.bf16.mxu1 %v2318_v37 }
 0xb78   :  { %2075 = vmatpush3.bf16.msra.mxu1 %v2280_v56 }
 0xc36   :  { %v1231_v39 = vpop.f32.mrb[16].mxu1 }
 0xc37   :  { %v1232_v40 = vadd.f32 %v1231_v39, %v1126_v36  ;;  %v2046_v41 = vpop.f32.mrb[17].mxu1 }
 0xc38   :  { %v1234_v18 = vpop.f32.mrb[18].mxu1 }
 0xc39   :  { %v1238_v42 = vmul.f32 0.3, %v1232_v40  ;;  %v1235_v43 = vadd.f32 %v1234_v18, %v1126_v36  ;;  %v2047_v44 = vpop.f32.mrb[19].mxu1 }
 0xc3b   :  { %v2798_v45 = vadd.f32 %v1238_v42, %v2710_v31  ;;  %v1239_v46 = vmul.f32 0.3, %v1235_v43 }
 0xc3d   :  { %v1242_v47 = vmax.f32 %v2798_v45, 0.0  ;;  %v2803_v48 = vadd.f32 %v1239_v46, %v2715_v34  ;;  %v2282_v46 = vld [vmem:[%s2905_s3 + $0x1e8] sm:$0xff]  }
 0xc3f   :  { %v1243_v49 = vmax.f32 %v2803_v48, 0.0  ;;  %v1260_v50 = vrot.slane %v1242_v47, 6  ;;  %v1266_v53 = vrot.slane %v1242_v47, 2 }
 0xc41   :  { %v1261_v51 = vrot.slane %v1243_v49, 6  ;;  %v2177_v52 = vpack.i.bf16 %v1243_v49, %v1242_v47  ;;  %v1267_v54 = vrot.slane %v1243_v49, 2  ;;  %v1265_v63 = vsel %vm199_vm0, 0.0, %v1260_v50  ;;  %v1384_v47 = vld [vmem:[%s2906_s4 + $0x12] ss:$0 sm:$0xff] }
 0xc43   :  { %2178 = vrot.lane.b32.xlu0 %v2177_v52, %s2319_s8  ;;  %v1268_v31 = vsel %vm203_vm2, %v1266_v53, %v1267_v54  ;;  %v1270_v57 = vsel %vm203_vm2, %v1267_v54, 0.0  ;;  %v1262_v58 = vsel %vm199_vm0, %v1260_v50, %v1261_v51 }
 0xc44   :  { %v2182_v59 = vpack.i.bf16 %v1270_v57, %v1268_v31 }
 0xc46   :  { %2183 = vrot.lane.b32.xlu1 %v2182_v59, %s2316_s0 }
 0xcb5   :  { %v2179_v34 = vpop.permute.xlu0 %2178 }
 0xcb6   :  { %v2181_v60 = vunpack.i.h.bf16 %v2179_v34  ;;  %v2180_v61 = vunpack.i.l.bf16 %v2179_v34 }
 0xcb8   :  { %v2184_v62 = vpop.permute.xlu1 %2183  ;;  %v1284_v2 = vsel %vm249_vm4, %v1265_v63, %v2180_v61  ;;  %v1285_v3 = vsel %vm249_vm4, %v1262_v58, %v2181_v60 }
 0xcb9   :  { %v2186_v0 = vunpack.i.h.bf16 %v2184_v62  ;;  %v2185_v1 = vunpack.i.l.bf16 %v2184_v62 }
 0xcbb   :  { %v1286_v4 = vsel %vm252_vm5, %v1284_v2, %v2185_v1  ;;  %v1287_v6 = vsel %vm252_vm5, %v1285_v3, %v2186_v0 }
 0xcbc   :  { %v1288_v7 = vpack.c.bf16 %v1287_v6, %v1286_v4 }
 0xcbe   :  { %2061 = vmatmul.mubr.msk.bf16.vlgmr.msra.gmra.mrb[16].mxu0 %vm292_vm6, %v1288_v7 }
 0xcbf   :  { %2084 = vmatprep.mubr.msk.bf16.mxu0 %vm2320_vm3, %v2318_v37  ;;  %2081 = vmatpush3.bf16.msra.mxu0 %v2281_v21 }
 0xcc0   :  { %2082 = vmatprep.subr.bf16.mxu0 %v2318_v37 }
 0xcc3   :  { %2083 = vmatpush3.bf16.msra.mxu0 %v2282_v46 }
 0xd91   :  { %v1362_v15 = vpop.f32.mrb[16].mxu0 }
 0xd92   :  { %v1363_v16 = vadd.f32 %v1362_v15, %v1257_v14  ;;  %v2062_v17 = vpop.f32.mrb[17].mxu0 }
 0xd93   :  { %v1365_v55 = vpop.f32.mrb[18].mxu0 }
 0xd94   :  { %v1369_v19 = vmax.f32 %v1363_v16, 0.0  ;;  %v1366_v20 = vadd.f32 %v1365_v55, %v1257_v14  ;;  %v2063_v22 = vpop.f32.mrb[19].mxu0  ;;  %v1541_v16 = vld [vmem:[%s2906_s4 + $0x13] ss:$0 sm:$0xff]  ;;  %v1599_v55 = vld [vmem:[%s2903_s1] sm:$0xff] }
 0xd96   :  { %v1370_v23 = vmax.f32 %v1366_v20, 0.0  ;;  %v1387_v24 = vrot.slane %v1369_v19, 6  ;;  %v1393_v25 = vrot.slane %v1369_v19, 2 }
 0xd98   :  { %v1388_v26 = vrot.slane %v1370_v23, 6  ;;  %v1394_v27 = vrot.slane %v1370_v23, 2  ;;  %v2187_v5 = vpack.i.bf16 %v1370_v23, %v1369_v19  ;;  %v1392_v38 = vsel %vm199_vm0, 0.0, %v1387_v24  ;;  %v1600_v23 = vld [vmem:[%s2903_s1 + $0x8] sm:$0xff]  ;;  %s2321_s1 = smov [#allocation2]  }
 0xd99   :  { %s1635_s4 = sshll.u32 %s2321_s1, 4  ;;  %s1636_s4 = int_to_ptr.vmem [resolvable:$true] %s1635_s4 }
 0xd9a   :  { %2188 = vrot.lane.b32.xlu0 %v2187_v5, %s2319_s8  ;;  %v1395_v28 = vsel %vm203_vm2, %v1393_v25, %v1394_v27  ;;  %v1397_v29 = vsel %vm203_vm2, %v1394_v27, 0.0  ;;  %v1389_v30 = vsel %vm199_vm0, %v1387_v24, %v1388_v26  ;;  %s2291_s27 = scalar_lea.vmem %s1636_s4, 256  ;;  %p2296_p1 = scmp.lt.s32.totalorder %s1636_s4, %s1636_s4 }
 0xd9b   :  { %v2192_v8 = vpack.i.bf16 %v1397_v29, %v1395_v28  ;;  %p2292_p0 = scmp.ne.s32.totalorder %s1636_s4, %s2291_s27  ;;  %p2297_p2 = scmp.lt.s32.totalorder %s2291_s27, %s2291_s27 }
 0xd9d   :  { %2193 = vrot.lane.b32.xlu1 %v2192_v8, %s2316_s0  ;;  %p2298_p3 = por %p2297_p2, %p2296_p1 }
 0xd9f   :  { %p2299_p4 = pnand %p2298_p3, %p2292_p0 }
 0xe0c   :  { %v2189_v32 = vpop.permute.xlu0 %2188 }
 0xe0d   :  { %v2191_v33 = vunpack.i.h.bf16 %v2189_v32  ;;  %v2190_v35 = vunpack.i.l.bf16 %v2189_v32 }
 0xe0f   :  { %v2194_v36 = vpop.permute.xlu1 %2193  ;;  %v1411_v41 = vsel %vm249_vm4, %v1392_v38, %v2190_v35  ;;  %v1412_v18 = vsel %vm249_vm4, %v1389_v30, %v2191_v33 }
 0xe10   :  { %v2196_v39 = vunpack.i.h.bf16 %v2194_v36  ;;  %v2195_v40 = vunpack.i.l.bf16 %v2194_v36 }
 0xe12   :  { %v1413_v42 = vsel %vm252_vm5, %v1411_v41, %v2195_v40  ;;  %v1414_v43 = vsel %vm252_vm5, %v1412_v18, %v2196_v39 }
 0xe13   :  { %v1415_v44 = vpack.c.bf16 %v1414_v43, %v1413_v42 }
 0xe15   :  { %2077 = vmatmul.mubr.msk.bf16.vlgmr.msra.gmra.mrb[20].mxu1 %vm292_vm6, %v1415_v44 }
 0xee8   :  { %v1489_v49 = vpop.f32.mrb[20].mxu1 }
 0xee9   :  { %v1490_v50 = vadd.f32 %v1489_v49, %v1384_v47  ;;  %v2078_v51 = vpop.f32.mrb[21].mxu1 }
 0xeea   :  { %v1492_v52 = vpop.f32.mrb[22].mxu1 }
 0xeeb   :  { %v1496_v53 = vmul.f32 0.3, %v1490_v50  ;;  %v1493_v54 = vadd.f32 %v1492_v52, %v1384_v47  ;;  %v2079_v31 = vpop.f32.mrb[23].mxu1 }
 0xeed   :  { %v1498_v57 = vadd.f32 %v1496_v53, %v2798_v45  ;;  %v1497_v58 = vmul.f32 0.3, %v1493_v54 }
 0xeef   :  { %v1501_v59 = vrot.slane %v1498_v57, 1  ;;  %v1503_v34 = vrot.slane %v1498_v57, 2  ;;  %v1505_v60 = vrot.slane %v1498_v57, 3  ;;  %v1499_v37 = vadd.f32 %v1497_v58, %v2803_v48 }
 0xef0   :  { %v1516_v61 = vrot.slane %v1498_v57, 4 }
 0xef1   :  { %v1519_v62 = vsel %vm1518_vm7, %v1498_v57, %v1501_v59  ;;  %v1529_v63 = vsel %vm1518_vm7, %v1501_v59, %v1503_v34  ;;  %v1508_v2 = vrot.slane %v1499_v37, 4  ;;  %v1510_v3 = vrot.slane %v1499_v37, 5 }
 0xef2   :  { %v1520_v0 = vsel %vm199_vm0, %v1519_v62, %v1503_v34  ;;  %v1530_v1 = vsel %vm199_vm0, %v1529_v63, %v1505_v60  ;;  %v1512_v6 = vrot.slane %v1499_v37, 6  ;;  %v1514_v7 = vrot.slane %v1499_v37, 7 }
 0xef3   :  { %v1522_v4 = vsel %vm1521_vm8, %v1520_v0, %v1505_v60  ;;  %v1531_v45 = vsel %vm1521_vm8, %v1530_v1, %v1516_v61 }
 0xef4   :  { %v1523_v9 = vsel %vm201_vm1, %v1522_v4, %v1508_v2  ;;  %v1532_v10 = vsel %vm201_vm1, %v1531_v45, %v1510_v3 }
 0xef5   :  { %v1525_v48 = vsel %vm1524_vm9, %v1523_v9, %v1510_v3  ;;  %v1533_v11 = vsel %vm1524_vm9, %v1532_v10, %v1512_v6 }
 0xef6   :  { %v1526_v12 = vsel %vm203_vm2, %v1525_v48, %v1512_v6  ;;  %v1534_v13 = vsel %vm203_vm2, %v1533_v11, %v1514_v7 }
 0xef7   :  { %v1528_v14 = vsel %vm1527_vm10, %v1526_v12, %v1514_v7  ;;  %v1535_v56 = vsel %vm1527_vm10, %v1534_v13, %v1499_v37 }
 0xef8   :  { %v1542_v15 = vpack.c.bf16 %v1535_v56, %v1528_v14 }
 0xefa   :  { %2085 = vmatmul.mubr.msk.bf16.vlgmr.msra.gmra.mrb[20].mxu0 %vm249_vm4, %v1542_v15 }
 0xfcd   :  { %v1592_v17 = vpop.f32.mrb[20].mxu0 }
 0xfce   :  { %v1593_v19 = vadd.f32 %v1592_v17, %v1541_v16  ;;  %v2086_v20 = vpop.f32.mrb[21].mxu0 }
 0xfcf   :  { %v1595_v22 = vpop.f32.mrb[22].mxu0 }
 0xfd0   :  { %v1601_v24 = vadd.f32 %v1599_v55, %v1593_v19  ;;  %v1596_v25 = vadd.f32 %v1595_v22, %v1541_v16  ;;  %v2087_v26 = vpop.f32.mrb[23].mxu0 }
 0xfd2   :  { %v1602_v27 = vadd.f32 %v1600_v23, %v1596_v25  ;;  %v1603_v5 = vmul.f32 1.3333334, %v1601_v24 }
 0xfd4   :  { %v1606_v28 = vsel %vm1605_vm11, %v1603_v5, -inf  ;;  %v1604_v29 = vmul.f32 1.3333334, %v1602_v27 }
 0xfd5   :  { %1607 = vmax.xlane.f32.xlu0 %v1606_v28 }
 0xfd6   :  { %v1609_v30 = vsel %vm1605_vm11, %v1604_v29, -inf }
 0xfd7   :  { %1610 = vmax.xlane.f32.xlu1 %v1609_v30 }
0x1062   :  { %v1608_v8 = vpop.xlane.xlu0 %1607 }
0x1063   :  { %v1612_v32 = vsub.f32 %v1603_v5, %v1608_v8 }
0x1064   :  { %v1611_v33 = vpop.xlane.xlu1 %1610 }
0x1065   :  { %v1614_v35 = vmul.f32 1.442695, %v1612_v32  ;;  %v1613_v36 = vsub.f32 %v1604_v29, %v1611_v33 }
0x1067   :  { %2283 = vpow2.f32 %v1614_v35  ;;  %v1616_v38 = vmul.f32 1.442695, %v1613_v36 }
0x1069   :  { %2285 = vpow2.f32 %v1616_v38 }
0x1071   :  { %v2284_v39 = vpop.eup %2283 }
0x1072   :  { %v1618_v40 = vsel %vm1605_vm11, %v2284_v39, 0.0 }
0x1073   :  { %v2286_v41 = vpop.eup %2285  ;;  %1619 = vadd.xlane.f32.xlu0 %v1618_v40 }
0x1074   :  { %v1621_v18 = vsel %vm1605_vm11, %v2286_v41, 0.0 }
0x1077   :  { %1622 = vadd.xlane.f32.xlu0 %v1621_v18 }
0x1100   :  { %v1620_v42 = vpop.xlane.xlu0 %1619 }
0x1101   :  { %2287 = vrcp.f32 %v1620_v42 }
0x1104   :  { %v1623_v43 = vpop.xlane.xlu0 %1622 }
0x1105   :  { %2289 = vrcp.f32 %v1623_v43 }
0x110b   :  { %v2288_v44 = vpop.eup %2287 }
0x110c   :  { %v1626_v21 = vmul.f32 %v2288_v44, %v2284_v39 }
0x110e   :  { %1628 = vst.msk [vmem:[#allocation2] sm:$0xff] %vm1605_vm11, %v1626_v21 }
0x110f   :  { %v2290_v46 = vpop.eup %2289 }
0x1110   :  { %v1627_v47 = vmul.f32 %v2290_v46, %v2286_v41 }
0x1112   :  { %1629 = vst.msk [vmem:[#allocation2 + $0x8] sm:$0xff] %vm1605_vm11, %v1627_v47 }
0x1113   :  { %2302 = shalt.err (!%p2299_p4)
}
0x1114   :  { %s2303_s29 = scalar_lea.hbm %s2907_s5, 256 }
0x1115   :  { %p2304_p5 = scmp.ne.s32.totalorder %s2907_s5, %s2303_s29  ;;  %p2307_p6 = scmp.lt.u32.totalorder %s2303_s29, %s2907_s5 }
0x1117   :  { %p2309_p7 = pnand %p2307_p6, %p2304_p5 }
0x1119   :  { %2312 = shalt.err (!%p2309_p7)
}
0x111a   :  { %s2322_s10 = smov 128   ;;  %s2323_s11 = smov 8  }
0x111b   :  { %1641 = dma.vmem_to_hbm [thread:$0]  %s1636_s4, 256, %s2907_s5, [#allocation3], %s2322_s10, %s2322_s10, %s2323_s11  }
0x111c   :  { %2313 = dma.done.wait [#allocation3], 256  }
0x111d   :  { %2314 = vsyncadd [#allocation3], 4294967040 }
0x111e   :  { %1645 = vsyncpa [#allocation3], 1 }

</bundles_post_ra>
